<compile_context>
chip_gen: v5e
topology: v5e:2x2
jax: 0.10.0
libtpu: 0.0.40
codegen_flags: <defaults>
</compile_context>

<pallas_src>
import numpy as np
import jax
import jax.numpy as jnp
from jax import lax
from jax.experimental import pallas as pl
from jax.experimental.pallas import tpu as pltpu

TEMPERATURE = 0.1
SCALES = (1.0, 0.5, 0.25)

_NORM_EPS = 1e-12   # F.normalize default eps (pred branch)
_COS_EPS = 1e-8     # F.cosine_similarity default eps (mask branch)
_LANE = 128


# ----------------------------- interpolation weights -----------------------------

def _bilinear_matrix(out_size, in_size):
    """Row-interpolation matrix matching F.interpolate(bilinear, align_corners=False)."""
    if out_size == in_size:
        return np.eye(out_size, dtype=np.float32)
    scale = in_size / out_size
    o = np.arange(out_size, dtype=np.float64)
    src = np.maximum((o + 0.5) * scale - 0.5, 0.0)
    i0 = np.minimum(np.floor(src).astype(np.int64), in_size - 1)
    i1 = np.minimum(i0 + 1, in_size - 1)
    lam = (src - i0).astype(np.float32)
    m = np.zeros((out_size, in_size), dtype=np.float32)
    m[np.arange(out_size), i0] += (1.0 - lam)
    m[np.arange(out_size), i1] += lam
    return m


def _round_up(x, m):
    return -(-x // m) * m


# ----------------------------- fused Pallas kernel -----------------------------

def _make_kernel(*, num_scales, batch, fold, tiles, grid_len, weights,
                 temperature, use_masks, resized):
    """Build the fused kernel body for a static (shapes, scales, masks) config."""
    inv_bt = np.float32(1.0 / (batch * temperature))
    inv_b = np.float32(1.0 / batch)
    inv_n = np.float32(1.0 / num_scales)
    norm_eps2 = np.float32(_NORM_EPS * _NORM_EPS)
    cos_eps2 = np.float32(_COS_EPS * _COS_EPS)
    resized = tuple(resized)

    n_in = 2 * num_scales + ((1 + 2 * len(resized)) if use_masks else 0)

    def _combine_subrows(acc_i):
        # (batch*fold, 3) -> (batch, 3): exact f32 sum of each batch row's
        # `fold` sub-rows (sublane-fold undo); no matmul -> no MXU rounding.
        if fold == 1:
            return acc_i
        return jnp.concatenate(
            [jnp.sum(acc_i[b * fold:(b + 1) * fold], axis=0, keepdims=True)
             for b in range(batch)], axis=0)

    def _mask_sim_sum(a, b):
        # a, b: (B, h, w) -> scalar sum over batch of cosine similarity.
        w12 = jnp.sum(jnp.sum(a * b, axis=-1), axis=-1, keepdims=True)   # (B,1)
        w1 = jnp.sum(jnp.sum(a * a, axis=-1), axis=-1, keepdims=True)
        w2 = jnp.sum(jnp.sum(b * b, axis=-1), axis=-1, keepdims=True)
        sim = w12 * lax.rsqrt(jnp.maximum(w1 * w2, cos_eps2))
        return jnp.sum(sim)

    def kernel(*refs):
        out_ref = refs[n_in]
        acc_ref = refs[n_in + 1]
        pred_refs = refs[:2 * num_scales]
        resize_refs = {}
        if use_masks:
            m_ref = refs[2 * num_scales]
            pos = 2 * num_scales + 1
            for i in resized:
                resize_refs[i] = (refs[pos], refs[pos + 1])
                pos += 2

        j = pl.program_id(0)

        @pl.when(j == 0)
        def _init():
            acc_ref[...] = jnp.zeros_like(acc_ref)

        # ---- per-scale partial sums over the current lane tile ----
        for i in range(num_scales):
            def _accum(i=i):
                p1 = pred_refs[2 * i][...].astype(jnp.float32)        # (B*fold, T)
                p2 = pred_refs[2 * i + 1][...].astype(jnp.float32)
                acc_ref[i, :, 0:1] += jnp.sum(p1 * p2, axis=1, keepdims=True)
                acc_ref[i, :, 1:2] += jnp.sum(p1 * p1, axis=1, keepdims=True)
                acc_ref[i, :, 2:3] += jnp.sum(p2 * p2, axis=1, keepdims=True)

            if tiles[i] == grid_len:
                _accum()
            else:
                pl.when(j < tiles[i])(_accum)

        # ---- finalize: normalize pred sims, mask cosine sims, weighted total ----
        @pl.when(j == grid_len - 1)
        def _finalize():
            m = None
            id_msum = None
            if use_masks:
                m = m_ref[...].astype(jnp.float32)                     # (2B, Hm, Wm)
                if len(resized) < num_scales:
                    # hoisted: identity-resolution mask similarity computed once
                    id_msum = _mask_sim_sum(m[:batch], m[batch:])

            total = jnp.float32(0.0)
            for i in range(num_scales):
                acc_i = _combine_subrows(acc_ref[i])                   # (B, 3)
                d = acc_i[:, 0:1]
                n1 = acc_i[:, 1:2]
                n2 = acc_i[:, 2:3]
                # F.normalize(dim=1) semantics: p / max(||p||, eps)
                sim = d * (lax.rsqrt(jnp.maximum(n1, norm_eps2)) *
                           lax.rsqrt(jnp.maximum(n2, norm_eps2)))
                loss_i = -jnp.sum(sim) * inv_bt

                if use_masks:
                    if i in resize_refs:
                        ww_b_ref, wh_b_ref = resize_refs[i]
                        # separable bilinear resize: contract W, then H (batched MXU matmuls)
                        t = jnp.einsum('bhw,bwq->bhq', m, ww_b_ref[...],
                                       preferred_element_type=jnp.float32)
                        r = jnp.einsum('bph,bhq->bpq', wh_b_ref[...], t,
                                       preferred_element_type=jnp.float32)
                        msum = _mask_sim_sum(r[:batch], r[batch:])
                    else:
                        msum = id_msum
                    loss_i = loss_i - msum * inv_b

                total = total + np.float32(weights[i]) * loss_i

            out_ref[0, 0] = total * inv_n

    return kernel


# ----------------------------- wrapper -----------------------------

def multi_scale_consistency_loss(pred1_list, pred2_list, mask1=None, mask2=None,
                                 temperature=TEMPERATURE, scales=SCALES,
                                 lane_tile=2048):
    num_scales = len(pred1_list)
    batch = int(pred1_list[0].shape[0])
    use_masks = mask1 is not None and mask2 is not None
    weights = [scales[i] if i < len(scales) else 1.0 for i in range(num_scales)]

    # sublane fold: B<8 -> split each batch row into k sub-rows so vregs are full
    fold = 1 if batch >= 8 else max(1, 8 // batch)
    rows = batch * fold
    lane_tile = max(_LANE, (int(lane_tile) // _LANE) * _LANE)

    inputs, in_specs, tiles, pred_hw = [], [], [], []
    for p1, p2 in zip(pred1_list, pred2_list):
        assert p1.shape == p2.shape and int(p1.shape[0]) == batch
        pred_hw.append(tuple(int(s) for s in p1.shape[-2:]))
        hw = int(np.prod(p1.shape[1:]))
        c0 = -(-hw // fold)                          # cols per sub-row (ceil)
        if c0 <= lane_tile:
            width = _round_up(c0, _LANE)
            blk_w, n_t = width, 1
        else:
            width = _round_up(c0, lane_tile)
            blk_w, n_t = lane_tile, width // lane_tile
        tiles.append(n_t)
        for p in (p1, p2):
            flat = p.reshape(batch, -1)              # lane-dense, native dtype
            if fold * width != hw:
                flat = jnp.pad(flat, ((0, 0), (0, fold * width - hw)))
            inputs.append(flat.reshape(rows, width))
            if n_t == 1:
                in_specs.append(pl.BlockSpec((rows, blk_w), lambda j: (0, 0)))
            else:
                in_specs.append(pl.BlockSpec(
                    (rows, blk_w),
                    lambda j, n_t=n_t: (0, jnp.minimum(j, n_t - 1))))
    grid_len = max(tiles)

    resized = []
    if use_masks:
        bm, cm, hm, wm = (int(s) for s in mask1.shape)
        assert cm == 1 and bm == batch and mask2.shape == mask1.shape
        # stack both masks along batch -> both resized by the same batched matmuls
        m3 = jnp.concatenate([mask1, mask2], axis=0).reshape(2 * batch, hm, wm)
        inputs.append(m3)
        in_specs.append(pl.BlockSpec((2 * batch, hm, wm), lambda j: (0, 0, 0)))
        for i, (h, w) in enumerate(pred_hw):
            if (h, w) == (hm, wm):
                continue                              # identity resize: hoisted in-kernel
            resized.append(i)
            ww_t = np.ascontiguousarray(_bilinear_matrix(w, wm).T)     # (Wm, w)
            wh = _bilinear_matrix(h, hm)                               # (h, Hm)
            ww_b = np.ascontiguousarray(np.broadcast_to(ww_t, (2 * batch,) + ww_t.shape))
            wh_b = np.ascontiguousarray(np.broadcast_to(wh, (2 * batch,) + wh.shape))
            inputs.append(jnp.asarray(ww_b))
            in_specs.append(pl.BlockSpec(ww_b.shape, lambda j: (0, 0, 0)))
            inputs.append(jnp.asarray(wh_b))
            in_specs.append(pl.BlockSpec(wh_b.shape, lambda j: (0, 0, 0)))

    kernel = _make_kernel(num_scales=num_scales, batch=batch, fold=fold,
                          tiles=tuple(int(t) for t in tiles), grid_len=int(grid_len),
                          weights=tuple(weights), temperature=temperature,
                          use_masks=use_masks, resized=tuple(resized))

    out = pl.pallas_call(
        kernel,
        out_shape=jax.ShapeDtypeStruct((1, 1), jnp.float32),
        grid=(grid_len,),
        in_specs=in_specs,
        out_specs=pl.BlockSpec((1, 1), lambda j: (0, 0),
                               memory_space=pltpu.MemorySpace.SMEM),
        scratch_shapes=[pltpu.VMEM((num_scales, rows, 3), jnp.float32)],
        compiler_params=pltpu.CompilerParams(
            dimension_semantics=("arbitrary",),           # feature-tile reduction axis
            vmem_limit_bytes=32 * 1024 * 1024),
    )(*inputs)
    return out[0, 0]


# ----------------------------- pure-JAX reference -----------------------------

def _reference_loss(pred1_list, pred2_list, mask1, mask2,
                    temperature=TEMPERATURE, scales=SCALES):
    def cos_norm(a, b):
        a = a.reshape(a.shape[0], -1)
        b = b.reshape(b.shape[0], -1)
        na = jnp.maximum(jnp.linalg.norm(a, axis=1), _NORM_EPS)
        nb = jnp.maximum(jnp.linalg.norm(b, axis=1), _NORM_EPS)
        return jnp.sum((a / na[:, None]) * (b / nb[:, None]), axis=1)

    def cos_sim(a, b):
        a = a.reshape(a.shape[0], -1)
        b = b.reshape(b.shape[0], -1)
        w12 = jnp.sum(a * b, axis=1)
        w1 = jnp.sum(a * a, axis=1)
        w2 = jnp.sum(b * b, axis=1)
        return w12 / jnp.sqrt(jnp.maximum(w1 * w2, _COS_EPS * _COS_EPS))

    def resize(m, size):
        hm, wm = m.shape[-2:]
        wh = jnp.asarray(_bilinear_matrix(size[0], hm))
        ww = jnp.asarray(_bilinear_matrix(size[1], wm))
        return jnp.einsum('ph,bchw,qw->bcpq', wh, m, ww)

    total = jnp.float32(0.0)
    for i, (p1, p2) in enumerate(zip(pred1_list, pred2_list)):
        sw = scales[i] if i < len(scales) else 1.0
        loss = -jnp.mean(cos_norm(p1, p2) / temperature)
        if mask1 is not None and mask2 is not None:
            m1r = resize(mask1, p1.shape[-2:])
            m2r = resize(mask2, p2.shape[-2:])
            loss = loss - jnp.mean(cos_sim(m1r, m2r))
        total = total + sw * loss
    return total / len(pred1_list)


# ----------------------------- main -----------------------------

if __name__ == "__main__":
    key = jax.random.PRNGKey(0)
    k1, k2, k3, k4, k5, k6, k7, k8 = jax.random.split(key, 8)
    B = 2
    pred1_list = [
        jax.random.normal(k1, (B, 1, 16, 16), jnp.float32),
        jax.random.normal(k2, (B, 1, 8, 8), jnp.float32),
        jax.random.normal(k3, (B, 1, 4, 4), jnp.float32),
    ]
    pred2_list = [
        jax.random.normal(k4, (B, 1, 16, 16), jnp.float32),
        jax.random.normal(k5, (B, 1, 8, 8), jnp.float32),
        jax.random.normal(k6, (B, 1, 4, 4), jnp.float32),
    ]
    mask1 = jax.random.uniform(k7, (B, 1, 16, 16), jnp.float32)
    mask2 = jax.random.uniform(k8, (B, 1, 16, 16), jnp.float32)

    # with masks
    out = multi_scale_consistency_loss(pred1_list, pred2_list, mask1, mask2,
                                       temperature=TEMPERATURE, scales=SCALES)
    out = jax.block_until_ready(out)
    ref = jax.block_until_ready(_reference_loss(pred1_list, pred2_list, mask1, mask2,
                                                temperature=TEMPERATURE, scales=SCALES))
    assert np.isfinite(float(out))
    np.testing.assert_allclose(float(out), float(ref), rtol=1e-4, atol=1e-4)

    # without masks
    out_nm = jax.block_until_ready(
        multi_scale_consistency_loss(pred1_list, pred2_list, None, None,
                                     temperature=TEMPERATURE, scales=SCALES))
    ref_nm = jax.block_until_ready(
        _reference_loss(pred1_list, pred2_list, None, None,
                        temperature=TEMPERATURE, scales=SCALES))
    np.testing.assert_allclose(float(out_nm), float(ref_nm), rtol=1e-4, atol=1e-4)

    print("KERNEL_OK")
</pallas_src>

<mosaic_0001>
module attributes {stable_mosaic.version = 11 : i64} {
  func.func @kernel(%arg0: i32, %arg1: memref<8x128xf32, #tpu.memory_space<vmem>>, %arg2: memref<8x128xf32, #tpu.memory_space<vmem>>, %arg3: memref<8x128xf32, #tpu.memory_space<vmem>>, %arg4: memref<8x128xf32, #tpu.memory_space<vmem>>, %arg5: memref<8x128xf32, #tpu.memory_space<vmem>>, %arg6: memref<8x128xf32, #tpu.memory_space<vmem>>, %arg7: memref<4x16x16xf32, #tpu.memory_space<vmem>>, %arg8: memref<4x16x8xf32, #tpu.memory_space<vmem>>, %arg9: memref<4x8x16xf32, #tpu.memory_space<vmem>>, %arg10: memref<4x16x4xf32, #tpu.memory_space<vmem>>, %arg11: memref<4x4x16xf32, #tpu.memory_space<vmem>>, %arg12: memref<1x1xf32, #tpu.memory_space<smem>>, %arg13: memref<3x8x3xf32, #tpu.memory_space<vmem>>) attributes {dimension_semantics = [#tpu.dimension_semantics<arbitrary>], iteration_bounds = array<i64: 1>, scalar_prefetch = 0 : i64, scratch_operands = 1 : i64, tpu.core_type = #tpu.core_type<tc>, window_params = [{pipeline_mode = #tpu.pipeline_mode<synchronous>, transform_indices = @transform_0, window_bounds = array<i64: 8, 128>}, {pipeline_mode = #tpu.pipeline_mode<synchronous>, transform_indices = @transform_1, window_bounds = array<i64: 8, 128>}, {pipeline_mode = #tpu.pipeline_mode<synchronous>, transform_indices = @transform_2, window_bounds = array<i64: 8, 128>}, {pipeline_mode = #tpu.pipeline_mode<synchronous>, transform_indices = @transform_3, window_bounds = array<i64: 8, 128>}, {pipeline_mode = #tpu.pipeline_mode<synchronous>, transform_indices = @transform_4, window_bounds = array<i64: 8, 128>}, {pipeline_mode = #tpu.pipeline_mode<synchronous>, transform_indices = @transform_5, window_bounds = array<i64: 8, 128>}, {pipeline_mode = #tpu.pipeline_mode<synchronous>, transform_indices = @transform_6, window_bounds = array<i64: 4, 16, 16>}, {pipeline_mode = #tpu.pipeline_mode<synchronous>, transform_indices = @transform_7, window_bounds = array<i64: 4, 16, 8>}, {pipeline_mode = #tpu.pipeline_mode<synchronous>, transform_indices = @transform_8, window_bounds = array<i64: 4, 8, 16>}, {pipeline_mode = #tpu.pipeline_mode<synchronous>, transform_indices = @transform_9, window_bounds = array<i64: 4, 16, 4>}, {pipeline_mode = #tpu.pipeline_mode<synchronous>, transform_indices = @transform_10, window_bounds = array<i64: 4, 4, 16>}, {transform_indices = @transform_11, window_bounds = array<i64: 1, 1>}]} {
    %c0_i32 = arith.constant 0 : i32
    %0 = arith.cmpi eq, %arg0, %c0_i32 : i32
    %1 = arith.extui %0 : i1 to i32
    %c0_i32_0 = arith.constant 0 : i32
    %2 = arith.cmpi ne, %1, %c0_i32_0 : i32
    scf.if %2 {
      %cst_74 = arith.constant 0.000000e+00 : f32
      %93 = vector.broadcast %cst_74 : f32 to vector<3x8x3xf32>
      %c0_75 = arith.constant 0 : index
      %c0_76 = arith.constant 0 : index
      %c0_77 = arith.constant 0 : index
      %94 = vector.load %arg13[%c0_75, %c0_76, %c0_77] : memref<3x8x3xf32, #tpu.memory_space<vmem>>, vector<3x8x3xf32>
      tpu.vector_store %arg13[%c0_75, %c0_76, %c0_77], %93 {strides = array<i32>} : memref<3x8x3xf32, #tpu.memory_space<vmem>>, vector<3x8x3xf32>,
    } else {
    }
    %c0 = arith.constant 0 : index
    %c0_1 = arith.constant 0 : index
    %3 = vector.load %arg1[%c0, %c0_1] : memref<8x128xf32, #tpu.memory_space<vmem>>, vector<8x128xf32>
    %c0_2 = arith.constant 0 : index
    %c0_3 = arith.constant 0 : index
    %4 = vector.load %arg2[%c0_2, %c0_3] : memref<8x128xf32, #tpu.memory_space<vmem>>, vector<8x128xf32>
    %c0_4 = arith.constant 0 : index
    %c0_5 = arith.constant 0 : index
    %c0_6 = arith.constant 0 : index
    %5 = vector.load %arg13[%c0_4, %c0_5, %c0_6] : memref<3x8x3xf32, #tpu.memory_space<vmem>>, vector<1x8x1xf32>
    %6 = vector.shape_cast %5 : vector<1x8x1xf32> to vector<8x1xf32>
    %7 = arith.mulf %3, %4 : vector<8x128xf32>
    %cst = arith.constant dense<0.000000e+00> : vector<8xf32>
    %8 = vector.multi_reduction <add>, %7, %cst [1] : vector<8x128xf32> to vector<8xf32>
    %9 = vector.shape_cast %8 : vector<8xf32> to vector<8x1xf32>
    %10 = arith.addf %6, %9 : vector<8x1xf32>
    %c0_7 = arith.constant 0 : index
    %c0_8 = arith.constant 0 : index
    %c0_9 = arith.constant 0 : index
    %11 = vector.load %arg13[%c0_7, %c0_8, %c0_9] : memref<3x8x3xf32, #tpu.memory_space<vmem>>, vector<1x8x1xf32>
    %12 = vector.shape_cast %11 : vector<1x8x1xf32> to vector<8x1xf32>
    %13 = vector.shape_cast %10 : vector<8x1xf32> to vector<1x8x1xf32>
    tpu.vector_store %arg13[%c0_7, %c0_8, %c0_9], %13 {strides = array<i32>} : memref<3x8x3xf32, #tpu.memory_space<vmem>>, vector<1x8x1xf32>,
    %c0_10 = arith.constant 0 : index
    %c0_11 = arith.constant 0 : index
    %c1 = arith.constant 1 : index
    %14 = vector.load %arg13[%c0_10, %c0_11, %c1] : memref<3x8x3xf32, #tpu.memory_space<vmem>>, vector<1x8x1xf32>
    %15 = vector.shape_cast %14 : vector<1x8x1xf32> to vector<8x1xf32>
    %16 = arith.mulf %3, %3 : vector<8x128xf32>
    %cst_12 = arith.constant dense<0.000000e+00> : vector<8xf32>
    %17 = vector.multi_reduction <add>, %16, %cst_12 [1] : vector<8x128xf32> to vector<8xf32>
    %18 = vector.shape_cast %17 : vector<8xf32> to vector<8x1xf32>
    %19 = arith.addf %15, %18 : vector<8x1xf32>
    %c0_13 = arith.constant 0 : index
    %c0_14 = arith.constant 0 : index
    %c1_15 = arith.constant 1 : index
    %20 = vector.load %arg13[%c0_13, %c0_14, %c1_15] : memref<3x8x3xf32, #tpu.memory_space<vmem>>, vector<1x8x1xf32>
    %21 = vector.shape_cast %20 : vector<1x8x1xf32> to vector<8x1xf32>
    %22 = vector.shape_cast %19 : vector<8x1xf32> to vector<1x8x1xf32>
    tpu.vector_store %arg13[%c0_13, %c0_14, %c1_15], %22 {strides = array<i32>} : memref<3x8x3xf32, #tpu.memory_space<vmem>>, vector<1x8x1xf32>,
    %c0_16 = arith.constant 0 : index
    %c0_17 = arith.constant 0 : index
    %c2 = arith.constant 2 : index
    %23 = vector.load %arg13[%c0_16, %c0_17, %c2] : memref<3x8x3xf32, #tpu.memory_space<vmem>>, vector<1x8x1xf32>
    %24 = vector.shape_cast %23 : vector<1x8x1xf32> to vector<8x1xf32>
    %25 = arith.mulf %4, %4 : vector<8x128xf32>
    %cst_18 = arith.constant dense<0.000000e+00> : vector<8xf32>
    %26 = vector.multi_reduction <add>, %25, %cst_18 [1] : vector<8x128xf32> to vector<8xf32>
    %27 = vector.shape_cast %26 : vector<8xf32> to vector<8x1xf32>
    %28 = arith.addf %24, %27 : vector<8x1xf32>
    %c0_19 = arith.constant 0 : index
    %c0_20 = arith.constant 0 : index
    %c2_21 = arith.constant 2 : index
    %29 = vector.load %arg13[%c0_19, %c0_20, %c2_21] : memref<3x8x3xf32, #tpu.memory_space<vmem>>, vector<1x8x1xf32>
    %30 = vector.shape_cast %29 : vector<1x8x1xf32> to vector<8x1xf32>
    %31 = vector.shape_cast %28 : vector<8x1xf32> to vector<1x8x1xf32>
    tpu.vector_store %arg13[%c0_19, %c0_20, %c2_21], %31 {strides = array<i32>} : memref<3x8x3xf32, #tpu.memory_space<vmem>>, vector<1x8x1xf32>,
    %c0_22 = arith.constant 0 : index
    %c0_23 = arith.constant 0 : index
    %32 = vector.load %arg3[%c0_22, %c0_23] : memref<8x128xf32, #tpu.memory_space<vmem>>, vector<8x128xf32>
    %c0_24 = arith.constant 0 : index
    %c0_25 = arith.constant 0 : index
    %33 = vector.load %arg4[%c0_24, %c0_25] : memref<8x128xf32, #tpu.memory_space<vmem>>, vector<8x128xf32>
    %c1_26 = arith.constant 1 : index
    %c0_27 = arith.constant 0 : index
    %c0_28 = arith.constant 0 : index
    %34 = vector.load %arg13[%c1_26, %c0_27, %c0_28] : memref<3x8x3xf32, #tpu.memory_space<vmem>>, vector<1x8x1xf32>
    %35 = vector.shape_cast %34 : vector<1x8x1xf32> to vector<8x1xf32>
    %36 = arith.mulf %32, %33 : vector<8x128xf32>
    %cst_29 = arith.constant dense<0.000000e+00> : vector<8xf32>
    %37 = vector.multi_reduction <add>, %36, %cst_29 [1] : vector<8x128xf32> to vector<8xf32>
    %38 = vector.shape_cast %37 : vector<8xf32> to vector<8x1xf32>
    %39 = arith.addf %35, %38 : vector<8x1xf32>
    %c1_30 = arith.constant 1 : index
    %c0_31 = arith.constant 0 : index
    %c0_32 = arith.constant 0 : index
    %40 = vector.load %arg13[%c1_30, %c0_31, %c0_32] : memref<3x8x3xf32, #tpu.memory_space<vmem>>, vector<1x8x1xf32>
    %41 = vector.shape_cast %40 : vector<1x8x1xf32> to vector<8x1xf32>
    %42 = vector.shape_cast %39 : vector<8x1xf32> to vector<1x8x1xf32>
    tpu.vector_store %arg13[%c1_30, %c0_31, %c0_32], %42 {strides = array<i32>} : memref<3x8x3xf32, #tpu.memory_space<vmem>>, vector<1x8x1xf32>,
    %c1_33 = arith.constant 1 : index
    %c0_34 = arith.constant 0 : index
    %c1_35 = arith.constant 1 : index
    %43 = vector.load %arg13[%c1_33, %c0_34, %c1_35] : memref<3x8x3xf32, #tpu.memory_space<vmem>>, vector<1x8x1xf32>
    %44 = vector.shape_cast %43 : vector<1x8x1xf32> to vector<8x1xf32>
    %45 = arith.mulf %32, %32 : vector<8x128xf32>
    %cst_36 = arith.constant dense<0.000000e+00> : vector<8xf32>
    %46 = vector.multi_reduction <add>, %45, %cst_36 [1] : vector<8x128xf32> to vector<8xf32>
    %47 = vector.shape_cast %46 : vector<8xf32> to vector<8x1xf32>
    %48 = arith.addf %44, %47 : vector<8x1xf32>
    %c1_37 = arith.constant 1 : index
    %c0_38 = arith.constant 0 : index
    %c1_39 = arith.constant 1 : index
    %49 = vector.load %arg13[%c1_37, %c0_38, %c1_39] : memref<3x8x3xf32, #tpu.memory_space<vmem>>, vector<1x8x1xf32>
    %50 = vector.shape_cast %49 : vector<1x8x1xf32> to vector<8x1xf32>
    %51 = vector.shape_cast %48 : vector<8x1xf32> to vector<1x8x1xf32>
    tpu.vector_store %arg13[%c1_37, %c0_38, %c1_39], %51 {strides = array<i32>} : memref<3x8x3xf32, #tpu.memory_space<vmem>>, vector<1x8x1xf32>,
    %c1_40 = arith.constant 1 : index
    %c0_41 = arith.constant 0 : index
    %c2_42 = arith.constant 2 : index
    %52 = vector.load %arg13[%c1_40, %c0_41, %c2_42] : memref<3x8x3xf32, #tpu.memory_space<vmem>>, vector<1x8x1xf32>
    %53 = vector.shape_cast %52 : vector<1x8x1xf32> to vector<8x1xf32>
    %54 = arith.mulf %33, %33 : vector<8x128xf32>
    %cst_43 = arith.constant dense<0.000000e+00> : vector<8xf32>
    %55 = vector.multi_reduction <add>, %54, %cst_43 [1] : vector<8x128xf32> to vector<8xf32>
    %56 = vector.shape_cast %55 : vector<8xf32> to vector<8x1xf32>
    %57 = arith.addf %53, %56 : vector<8x1xf32>
    %c1_44 = arith.constant 1 : index
    %c0_45 = arith.constant 0 : index
    %c2_46 = arith.constant 2 : index
    %58 = vector.load %arg13[%c1_44, %c0_45, %c2_46] : memref<3x8x3xf32, #tpu.memory_space<vmem>>, vector<1x8x1xf32>
    %59 = vector.shape_cast %58 : vector<1x8x1xf32> to vector<8x1xf32>
    %60 = vector.shape_cast %57 : vector<8x1xf32> to vector<1x8x1xf32>
    tpu.vector_store %arg13[%c1_44, %c0_45, %c2_46], %60 {strides = array<i32>} : memref<3x8x3xf32, #tpu.memory_space<vmem>>, vector<1x8x1xf32>,
    %c0_47 = arith.constant 0 : index
    %c0_48 = arith.constant 0 : index
    %61 = vector.load %arg5[%c0_47, %c0_48] : memref<8x128xf32, #tpu.memory_space<vmem>>, vector<8x128xf32>
    %c0_49 = arith.constant 0 : index
    %c0_50 = arith.constant 0 : index
    %62 = vector.load %arg6[%c0_49, %c0_50] : memref<8x128xf32, #tpu.memory_space<vmem>>, vector<8x128xf32>
    %c2_51 = arith.constant 2 : index
    %c0_52 = arith.constant 0 : index
    %c0_53 = arith.constant 0 : index
    %63 = vector.load %arg13[%c2_51, %c0_52, %c0_53] : memref<3x8x3xf32, #tpu.memory_space<vmem>>, vector<1x8x1xf32>
    %64 = vector.shape_cast %63 : vector<1x8x1xf32> to vector<8x1xf32>
    %65 = arith.mulf %61, %62 : vector<8x128xf32>
    %cst_54 = arith.constant dense<0.000000e+00> : vector<8xf32>
    %66 = vector.multi_reduction <add>, %65, %cst_54 [1] : vector<8x128xf32> to vector<8xf32>
    %67 = vector.shape_cast %66 : vector<8xf32> to vector<8x1xf32>
    %68 = arith.addf %64, %67 : vector<8x1xf32>
    %c2_55 = arith.constant 2 : index
    %c0_56 = arith.constant 0 : index
    %c0_57 = arith.constant 0 : index
    %69 = vector.load %arg13[%c2_55, %c0_56, %c0_57] : memref<3x8x3xf32, #tpu.memory_space<vmem>>, vector<1x8x1xf32>
    %70 = vector.shape_cast %69 : vector<1x8x1xf32> to vector<8x1xf32>
    %71 = vector.shape_cast %68 : vector<8x1xf32> to vector<1x8x1xf32>
    tpu.vector_store %arg13[%c2_55, %c0_56, %c0_57], %71 {strides = array<i32>} : memref<3x8x3xf32, #tpu.memory_space<vmem>>, vector<1x8x1xf32>,
    %c2_58 = arith.constant 2 : index
    %c0_59 = arith.constant 0 : index
    %c1_60 = arith.constant 1 : index
    %72 = vector.load %arg13[%c2_58, %c0_59, %c1_60] : memref<3x8x3xf32, #tpu.memory_space<vmem>>, vector<1x8x1xf32>
    %73 = vector.shape_cast %72 : vector<1x8x1xf32> to vector<8x1xf32>
    %74 = arith.mulf %61, %61 : vector<8x128xf32>
    %cst_61 = arith.constant dense<0.000000e+00> : vector<8xf32>
    %75 = vector.multi_reduction <add>, %74, %cst_61 [1] : vector<8x128xf32> to vector<8xf32>
    %76 = vector.shape_cast %75 : vector<8xf32> to vector<8x1xf32>
    %77 = arith.addf %73, %76 : vector<8x1xf32>
    %c2_62 = arith.constant 2 : index
    %c0_63 = arith.constant 0 : index
    %c1_64 = arith.constant 1 : index
    %78 = vector.load %arg13[%c2_62, %c0_63, %c1_64] : memref<3x8x3xf32, #tpu.memory_space<vmem>>, vector<1x8x1xf32>
    %79 = vector.shape_cast %78 : vector<1x8x1xf32> to vector<8x1xf32>
    %80 = vector.shape_cast %77 : vector<8x1xf32> to vector<1x8x1xf32>
    tpu.vector_store %arg13[%c2_62, %c0_63, %c1_64], %80 {strides = array<i32>} : memref<3x8x3xf32, #tpu.memory_space<vmem>>, vector<1x8x1xf32>,
    %c2_65 = arith.constant 2 : index
    %c0_66 = arith.constant 0 : index
    %c2_67 = arith.constant 2 : index
    %81 = vector.load %arg13[%c2_65, %c0_66, %c2_67] : memref<3x8x3xf32, #tpu.memory_space<vmem>>, vector<1x8x1xf32>
    %82 = vector.shape_cast %81 : vector<1x8x1xf32> to vector<8x1xf32>
    %83 = arith.mulf %62, %62 : vector<8x128xf32>
    %cst_68 = arith.constant dense<0.000000e+00> : vector<8xf32>
    %84 = vector.multi_reduction <add>, %83, %cst_68 [1] : vector<8x128xf32> to vector<8xf32>
    %85 = vector.shape_cast %84 : vector<8xf32> to vector<8x1xf32>
    %86 = arith.addf %82, %85 : vector<8x1xf32>
    %c2_69 = arith.constant 2 : index
    %c0_70 = arith.constant 0 : index
    %c2_71 = arith.constant 2 : index
    %87 = vector.load %arg13[%c2_69, %c0_70, %c2_71] : memref<3x8x3xf32, #tpu.memory_space<vmem>>, vector<1x8x1xf32>
    %88 = vector.shape_cast %87 : vector<1x8x1xf32> to vector<8x1xf32>
    %89 = vector.shape_cast %86 : vector<8x1xf32> to vector<1x8x1xf32>
    tpu.vector_store %arg13[%c2_69, %c0_70, %c2_71], %89 {strides = array<i32>} : memref<3x8x3xf32, #tpu.memory_space<vmem>>, vector<1x8x1xf32>,
    %c0_i32_72 = arith.constant 0 : i32
    %90 = arith.cmpi eq, %arg0, %c0_i32_72 : i32
    %91 = arith.extui %90 : i1 to i32
    %c0_i32_73 = arith.constant 0 : i32
    %92 = arith.cmpi ne, %91, %c0_i32_73 : i32
    scf.if %92 {
      %c0_74 = arith.constant 0 : index
      %c0_75 = arith.constant 0 : index
      %c0_76 = arith.constant 0 : index
      %93 = vector.load %arg7[%c0_74, %c0_75, %c0_76] : memref<4x16x16xf32, #tpu.memory_space<vmem>>, vector<4x16x16xf32>
      %94 = vector.extract_strided_slice %93 {offsets = [0, 0, 0], sizes = [2, 16, 16], strides = [1, 1, 1]} : vector<4x16x16xf32> to vector<2x16x16xf32>
      %95 = vector.extract_strided_slice %93 {offsets = [2, 0, 0], sizes = [2, 16, 16], strides = [1, 1, 1]} : vector<4x16x16xf32> to vector<2x16x16xf32>
      %96 = arith.mulf %94, %95 : vector<2x16x16xf32>
      %cst_77 = arith.constant dense<0.000000e+00> : vector<2x16xf32>
      %97 = vector.multi_reduction <add>, %96, %cst_77 [2] : vector<2x16x16xf32> to vector<2x16xf32>
      %cst_78 = arith.constant dense<0.000000e+00> : vector<2xf32>
      %98 = vector.multi_reduction <add>, %97, %cst_78 [1] : vector<2x16xf32> to vector<2xf32>
      %99 = vector.shape_cast %98 : vector<2xf32> to vector<2x1xf32>
      %100 = arith.mulf %94, %94 : vector<2x16x16xf32>
      %cst_79 = arith.constant dense<0.000000e+00> : vector<2x16xf32>
      %101 = vector.multi_reduction <add>, %100, %cst_79 [2] : vector<2x16x16xf32> to vector<2x16xf32>
      %cst_80 = arith.constant dense<0.000000e+00> : vector<2xf32>
      %102 = vector.multi_reduction <add>, %101, %cst_80 [1] : vector<2x16xf32> to vector<2xf32>
      %103 = vector.shape_cast %102 : vector<2xf32> to vector<2x1xf32>
      %104 = arith.mulf %95, %95 : vector<2x16x16xf32>
      %cst_81 = arith.constant dense<0.000000e+00> : vector<2x16xf32>
      %105 = vector.multi_reduction <add>, %104, %cst_81 [2] : vector<2x16x16xf32> to vector<2x16xf32>
      %cst_82 = arith.constant dense<0.000000e+00> : vector<2xf32>
      %106 = vector.multi_reduction <add>, %105, %cst_82 [1] : vector<2x16xf32> to vector<2xf32>
      %107 = vector.shape_cast %106 : vector<2xf32> to vector<2x1xf32>
      %108 = arith.mulf %103, %107 : vector<2x1xf32>
      %cst_83 = arith.constant 1.000000e-16 : f32
      %109 = vector.broadcast %cst_83 : f32 to vector<2x1xf32>
      %110 = arith.maximumf %108, %109 : vector<2x1xf32>
      %111 = math.rsqrt %110 : vector<2x1xf32>
      %112 = arith.mulf %99, %111 : vector<2x1xf32>
      %113 = vector.shape_cast %112 : vector<2x1xf32> to vector<1x2x1xf32>
      %cst_84 = arith.constant dense<0.000000e+00> : vector<1xf32>
      %114 = vector.multi_reduction <add>, %113, %cst_84 [1, 2] : vector<1x2x1xf32> to vector<1xf32>
      %115 = vector.shape_cast %114 : vector<1xf32> to vector<1x1x1xf32>
      %116 = vector.extract %115[0, 0, 0] : f32 from vector<1x1x1xf32>
      %c0_85 = arith.constant 0 : index
      %c0_86 = arith.constant 0 : index
      %c0_87 = arith.constant 0 : index
      %117 = vector.load %arg13[%c0_85, %c0_86, %c0_87] : memref<3x8x3xf32, #tpu.memory_space<vmem>>, vector<1x8x3xf32>
      %118 = vector.shape_cast %117 : vector<1x8x3xf32> to vector<8x3xf32>
      %119 = vector.extract_strided_slice %118 {offsets = [0, 0], sizes = [4, 3], strides = [1, 1]} : vector<8x3xf32> to vector<4x3xf32>
      %cst_88 = arith.constant dense<0.000000e+00> : vector<3xf32>
      %120 = vector.multi_reduction <add>, %119, %cst_88 [0] : vector<4x3xf32> to vector<3xf32>
      %121 = vector.shape_cast %120 : vector<3xf32> to vector<1x3xf32>
      %122 = vector.extract_strided_slice %118 {offsets = [4, 0], sizes = [4, 3], strides = [1, 1]} : vector<8x3xf32> to vector<4x3xf32>
      %cst_89 = arith.constant dense<0.000000e+00> : vector<3xf32>
      %123 = vector.multi_reduction <add>, %122, %cst_89 [0] : vector<4x3xf32> to vector<3xf32>
      %124 = vector.shape_cast %123 : vector<3xf32> to vector<1x3xf32>
      %125 = tpu.concatenate %121, %124 in 0 : vector<1x3xf32>, vector<1x3xf32> -> vector<2x3xf32>
      %126 = vector.extract_strided_slice %125 {offsets = [0, 0], sizes = [2, 1], strides = [1, 1]} : vector<2x3xf32> to vector<2x1xf32>
      %127 = vector.extract_strided_slice %125 {offsets = [0, 1], sizes = [2, 1], strides = [1, 1]} : vector<2x3xf32> to vector<2x1xf32>
      %128 = vector.extract_strided_slice %125 {offsets = [0, 2], sizes = [2, 1], strides = [1, 1]} : vector<2x3xf32> to vector<2x1xf32>
      %cst_90 = arith.constant 1.000000e-24 : f32
      %129 = vector.broadcast %cst_90 : f32 to vector<2x1xf32>
      %130 = arith.maximumf %127, %129 : vector<2x1xf32>
      %131 = math.rsqrt %130 : vector<2x1xf32>
      %cst_91 = arith.constant 1.000000e-24 : f32
      %132 = vector.broadcast %cst_91 : f32 to vector<2x1xf32>
      %133 = arith.maximumf %128, %132 : vector<2x1xf32>
      %134 = math.rsqrt %133 : vector<2x1xf32>
      %135 = arith.mulf %131, %134 : vector<2x1xf32>
      %136 = arith.mulf %126, %135 : vector<2x1xf32>
      %137 = vector.shape_cast %136 : vector<2x1xf32> to vector<1x2x1xf32>
      %cst_92 = arith.constant dense<0.000000e+00> : vector<1xf32>
      %138 = vector.multi_reduction <add>, %137, %cst_92 [1, 2] : vector<1x2x1xf32> to vector<1xf32>
      %139 = vector.shape_cast %138 : vector<1xf32> to vector<1x1x1xf32>
      %140 = vector.extract %139[0, 0, 0] : f32 from vector<1x1x1xf32>
      %cst_93 = arith.constant 0.000000e+00 : f32
      %141 = arith.subf %cst_93, %140 : f32
      %cst_94 = arith.constant 5.000000e+00 : f32
      %142 = arith.mulf %141, %cst_94 : f32
      %cst_95 = arith.constant 5.000000e-01 : f32
      %143 = arith.mulf %116, %cst_95 : f32
      %144 = arith.subf %142, %143 : f32
      %cst_96 = arith.constant 1.000000e+00 : f32
      %145 = arith.mulf %cst_96, %144 : f32
      %cst_97 = arith.constant 0.000000e+00 : f32
      %146 = arith.addf %cst_97, %145 : f32
      %c1_98 = arith.constant 1 : index
      %c0_99 = arith.constant 0 : index
      %c0_100 = arith.constant 0 : index
      %147 = vector.load %arg13[%c1_98, %c0_99, %c0_100] : memref<3x8x3xf32, #tpu.memory_space<vmem>>, vector<1x8x3xf32>
      %148 = vector.shape_cast %147 : vector<1x8x3xf32> to vector<8x3xf32>
      %149 = vector.extract_strided_slice %148 {offsets = [0, 0], sizes = [4, 3], strides = [1, 1]} : vector<8x3xf32> to vector<4x3xf32>
      %cst_101 = arith.constant dense<0.000000e+00> : vector<3xf32>
      %150 = vector.multi_reduction <add>, %149, %cst_101 [0] : vector<4x3xf32> to vector<3xf32>
      %151 = vector.shape_cast %150 : vector<3xf32> to vector<1x3xf32>
      %152 = vector.extract_strided_slice %148 {offsets = [4, 0], sizes = [4, 3], strides = [1, 1]} : vector<8x3xf32> to vector<4x3xf32>
      %cst_102 = arith.constant dense<0.000000e+00> : vector<3xf32>
      %153 = vector.multi_reduction <add>, %152, %cst_102 [0] : vector<4x3xf32> to vector<3xf32>
      %154 = vector.shape_cast %153 : vector<3xf32> to vector<1x3xf32>
      %155 = tpu.concatenate %151, %154 in 0 : vector<1x3xf32>, vector<1x3xf32> -> vector<2x3xf32>
      %156 = vector.extract_strided_slice %155 {offsets = [0, 0], sizes = [2, 1], strides = [1, 1]} : vector<2x3xf32> to vector<2x1xf32>
      %157 = vector.extract_strided_slice %155 {offsets = [0, 1], sizes = [2, 1], strides = [1, 1]} : vector<2x3xf32> to vector<2x1xf32>
      %158 = vector.extract_strided_slice %155 {offsets = [0, 2], sizes = [2, 1], strides = [1, 1]} : vector<2x3xf32> to vector<2x1xf32>
      %cst_103 = arith.constant 1.000000e-24 : f32
      %159 = vector.broadcast %cst_103 : f32 to vector<2x1xf32>
      %160 = arith.maximumf %157, %159 : vector<2x1xf32>
      %161 = math.rsqrt %160 : vector<2x1xf32>
      %cst_104 = arith.constant 1.000000e-24 : f32
      %162 = vector.broadcast %cst_104 : f32 to vector<2x1xf32>
      %163 = arith.maximumf %158, %162 : vector<2x1xf32>
      %164 = math.rsqrt %163 : vector<2x1xf32>
      %165 = arith.mulf %161, %164 : vector<2x1xf32>
      %166 = arith.mulf %156, %165 : vector<2x1xf32>
      %167 = vector.shape_cast %166 : vector<2x1xf32> to vector<1x2x1xf32>
      %cst_105 = arith.constant dense<0.000000e+00> : vector<1xf32>
      %168 = vector.multi_reduction <add>, %167, %cst_105 [1, 2] : vector<1x2x1xf32> to vector<1xf32>
      %169 = vector.shape_cast %168 : vector<1xf32> to vector<1x1x1xf32>
      %170 = vector.extract %169[0, 0, 0] : f32 from vector<1x1x1xf32>
      %cst_106 = arith.constant 0.000000e+00 : f32
      %171 = arith.subf %cst_106, %170 : f32
      %cst_107 = arith.constant 5.000000e+00 : f32
      %172 = arith.mulf %171, %cst_107 : f32
      %c0_108 = arith.constant 0 : index
      %c0_109 = arith.constant 0 : index
      %c0_110 = arith.constant 0 : index
      %173 = vector.load %arg8[%c0_108, %c0_109, %c0_110] : memref<4x16x8xf32, #tpu.memory_space<vmem>>, vector<4x16x8xf32>
      "tpu.trace_start"() <{level = 10 : i32, message = "bhw,bwq->bhq"}> : () -> ()
      %cst_111 = arith.constant dense<0.000000e+00> : vector<4x16x8xf32>
      %174 = tpu.matmul %93, %173, %cst_111 {dimension_numbers = #tpu.dot_dimension_numbers<[2], [1], [1], [2], [0, 0, 0, 1, 1, 2], [0], [0]>} : vector<4x16x16xf32>, vector<4x16x8xf32>, vector<4x16x8xf32> -> vector<4x16x8xf32>
      "tpu.trace_stop"() : () -> ()
      %c0_112 = arith.constant 0 : index
      %c0_113 = arith.constant 0 : index
      %c0_114 = arith.constant 0 : index
      %175 = vector.load %arg9[%c0_112, %c0_113, %c0_114] : memref<4x8x16xf32, #tpu.memory_space<vmem>>, vector<4x8x16xf32>
      "tpu.trace_start"() <{level = 10 : i32, message = "bph,bhq->bpq"}> : () -> ()
      %cst_115 = arith.constant dense<0.000000e+00> : vector<4x8x8xf32>
      %176 = tpu.matmul %175, %174, %cst_115 {dimension_numbers = #tpu.dot_dimension_numbers<[2], [1], [1], [2], [0, 0, 0, 1, 1, 2], [0], [0]>} : vector<4x8x16xf32>, vector<4x16x8xf32>, vector<4x8x8xf32> -> vector<4x8x8xf32>
      "tpu.trace_stop"() : () -> ()
      %177 = vector.extract_strided_slice %176 {offsets = [0, 0, 0], sizes = [2, 8, 8], strides = [1, 1, 1]} : vector<4x8x8xf32> to vector<2x8x8xf32>
      %178 = vector.extract_strided_slice %176 {offsets = [2, 0, 0], sizes = [2, 8, 8], strides = [1, 1, 1]} : vector<4x8x8xf32> to vector<2x8x8xf32>
      %179 = arith.mulf %177, %178 : vector<2x8x8xf32>
      %cst_116 = arith.constant dense<0.000000e+00> : vector<2x8xf32>
      %180 = vector.multi_reduction <add>, %179, %cst_116 [2] : vector<2x8x8xf32> to vector<2x8xf32>
      %cst_117 = arith.constant dense<0.000000e+00> : vector<2xf32>
      %181 = vector.multi_reduction <add>, %180, %cst_117 [1] : vector<2x8xf32> to vector<2xf32>
      %182 = vector.shape_cast %181 : vector<2xf32> to vector<2x1xf32>
      %183 = arith.mulf %177, %177 : vector<2x8x8xf32>
      %cst_118 = arith.constant dense<0.000000e+00> : vector<2x8xf32>
      %184 = vector.multi_reduction <add>, %183, %cst_118 [2] : vector<2x8x8xf32> to vector<2x8xf32>
      %cst_119 = arith.constant dense<0.000000e+00> : vector<2xf32>
      %185 = vector.multi_reduction <add>, %184, %cst_119 [1] : vector<2x8xf32> to vector<2xf32>
      %186 = vector.shape_cast %185 : vector<2xf32> to vector<2x1xf32>
      %187 = arith.mulf %178, %178 : vector<2x8x8xf32>
      %cst_120 = arith.constant dense<0.000000e+00> : vector<2x8xf32>
      %188 = vector.multi_reduction <add>, %187, %cst_120 [2] : vector<2x8x8xf32> to vector<2x8xf32>
      %cst_121 = arith.constant dense<0.000000e+00> : vector<2xf32>
      %189 = vector.multi_reduction <add>, %188, %cst_121 [1] : vector<2x8xf32> to vector<2xf32>
      %190 = vector.shape_cast %189 : vector<2xf32> to vector<2x1xf32>
      %191 = arith.mulf %186, %190 : vector<2x1xf32>
      %cst_122 = arith.constant 1.000000e-16 : f32
      %192 = vector.broadcast %cst_122 : f32 to vector<2x1xf32>
      %193 = arith.maximumf %191, %192 : vector<2x1xf32>
      %194 = math.rsqrt %193 : vector<2x1xf32>
      %195 = arith.mulf %182, %194 : vector<2x1xf32>
      %196 = vector.shape_cast %195 : vector<2x1xf32> to vector<1x2x1xf32>
      %cst_123 = arith.constant dense<0.000000e+00> : vector<1xf32>
      %197 = vector.multi_reduction <add>, %196, %cst_123 [1, 2] : vector<1x2x1xf32> to vector<1xf32>
      %198 = vector.shape_cast %197 : vector<1xf32> to vector<1x1x1xf32>
      %199 = vector.extract %198[0, 0, 0] : f32 from vector<1x1x1xf32>
      %cst_124 = arith.constant 5.000000e-01 : f32
      %200 = arith.mulf %199, %cst_124 : f32
      %201 = arith.subf %172, %200 : f32
      %cst_125 = arith.constant 5.000000e-01 : f32
      %202 = arith.mulf %cst_125, %201 : f32
      %203 = arith.addf %146, %202 : f32
      %c2_126 = arith.constant 2 : index
      %c0_127 = arith.constant 0 : index
      %c0_128 = arith.constant 0 : index
      %204 = vector.load %arg13[%c2_126, %c0_127, %c0_128] : memref<3x8x3xf32, #tpu.memory_space<vmem>>, vector<1x8x3xf32>
      %205 = vector.shape_cast %204 : vector<1x8x3xf32> to vector<8x3xf32>
      %206 = vector.extract_strided_slice %205 {offsets = [0, 0], sizes = [4, 3], strides = [1, 1]} : vector<8x3xf32> to vector<4x3xf32>
      %cst_129 = arith.constant dense<0.000000e+00> : vector<3xf32>
      %207 = vector.multi_reduction <add>, %206, %cst_129 [0] : vector<4x3xf32> to vector<3xf32>
      %208 = vector.shape_cast %207 : vector<3xf32> to vector<1x3xf32>
      %209 = vector.extract_strided_slice %205 {offsets = [4, 0], sizes = [4, 3], strides = [1, 1]} : vector<8x3xf32> to vector<4x3xf32>
      %cst_130 = arith.constant dense<0.000000e+00> : vector<3xf32>
      %210 = vector.multi_reduction <add>, %209, %cst_130 [0] : vector<4x3xf32> to vector<3xf32>
      %211 = vector.shape_cast %210 : vector<3xf32> to vector<1x3xf32>
      %212 = tpu.concatenate %208, %211 in 0 : vector<1x3xf32>, vector<1x3xf32> -> vector<2x3xf32>
      %213 = vector.extract_strided_slice %212 {offsets = [0, 0], sizes = [2, 1], strides = [1, 1]} : vector<2x3xf32> to vector<2x1xf32>
      %214 = vector.extract_strided_slice %212 {offsets = [0, 1], sizes = [2, 1], strides = [1, 1]} : vector<2x3xf32> to vector<2x1xf32>
      %215 = vector.extract_strided_slice %212 {offsets = [0, 2], sizes = [2, 1], strides = [1, 1]} : vector<2x3xf32> to vector<2x1xf32>
      %cst_131 = arith.constant 1.000000e-24 : f32
      %216 = vector.broadcast %cst_131 : f32 to vector<2x1xf32>
      %217 = arith.maximumf %214, %216 : vector<2x1xf32>
      %218 = math.rsqrt %217 : vector<2x1xf32>
      %cst_132 = arith.constant 1.000000e-24 : f32
      %219 = vector.broadcast %cst_132 : f32 to vector<2x1xf32>
      %220 = arith.maximumf %215, %219 : vector<2x1xf32>
      %221 = math.rsqrt %220 : vector<2x1xf32>
      %222 = arith.mulf %218, %221 : vector<2x1xf32>
      %223 = arith.mulf %213, %222 : vector<2x1xf32>
      %224 = vector.shape_cast %223 : vector<2x1xf32> to vector<1x2x1xf32>
      %cst_133 = arith.constant dense<0.000000e+00> : vector<1xf32>
      %225 = vector.multi_reduction <add>, %224, %cst_133 [1, 2] : vector<1x2x1xf32> to vector<1xf32>
      %226 = vector.shape_cast %225 : vector<1xf32> to vector<1x1x1xf32>
      %227 = vector.extract %226[0, 0, 0] : f32 from vector<1x1x1xf32>
      %cst_134 = arith.constant 0.000000e+00 : f32
      %228 = arith.subf %cst_134, %227 : f32
      %cst_135 = arith.constant 5.000000e+00 : f32
      %229 = arith.mulf %228, %cst_135 : f32
      %c0_136 = arith.constant 0 : index
      %c0_137 = arith.constant 0 : index
      %c0_138 = arith.constant 0 : index
      %230 = vector.load %arg10[%c0_136, %c0_137, %c0_138] : memref<4x16x4xf32, #tpu.memory_space<vmem>>, vector<4x16x4xf32>
      "tpu.trace_start"() <{level = 10 : i32, message = "bhw,bwq->bhq"}> : () -> ()
      %cst_139 = arith.constant dense<0.000000e+00> : vector<4x16x4xf32>
      %231 = tpu.matmul %93, %230, %cst_139 {dimension_numbers = #tpu.dot_dimension_numbers<[2], [1], [1], [2], [0, 0, 0, 1, 1, 2], [0], [0]>} : vector<4x16x16xf32>, vector<4x16x4xf32>, vector<4x16x4xf32> -> vector<4x16x4xf32>
      "tpu.trace_stop"() : () -> ()
      %c0_140 = arith.constant 0 : index
      %c0_141 = arith.constant 0 : index
      %c0_142 = arith.constant 0 : index
      %232 = vector.load %arg11[%c0_140, %c0_141, %c0_142] : memref<4x4x16xf32, #tpu.memory_space<vmem>>, vector<4x4x16xf32>
      "tpu.trace_start"() <{level = 10 : i32, message = "bph,bhq->bpq"}> : () -> ()
      %cst_143 = arith.constant dense<0.000000e+00> : vector<4x4x4xf32>
      %233 = tpu.matmul %232, %231, %cst_143 {dimension_numbers = #tpu.dot_dimension_numbers<[2], [1], [1], [2], [0, 0, 0, 1, 1, 2], [0], [0]>} : vector<4x4x16xf32>, vector<4x16x4xf32>, vector<4x4x4xf32> -> vector<4x4x4xf32>
      "tpu.trace_stop"() : () -> ()
      %234 = vector.extract_strided_slice %233 {offsets = [0, 0, 0], sizes = [2, 4, 4], strides = [1, 1, 1]} : vector<4x4x4xf32> to vector<2x4x4xf32>
      %235 = vector.extract_strided_slice %233 {offsets = [2, 0, 0], sizes = [2, 4, 4], strides = [1, 1, 1]} : vector<4x4x4xf32> to vector<2x4x4xf32>
      %236 = arith.mulf %234, %235 : vector<2x4x4xf32>
      %cst_144 = arith.constant dense<0.000000e+00> : vector<2x4xf32>
      %237 = vector.multi_reduction <add>, %236, %cst_144 [2] : vector<2x4x4xf32> to vector<2x4xf32>
      %cst_145 = arith.constant dense<0.000000e+00> : vector<2xf32>
      %238 = vector.multi_reduction <add>, %237, %cst_145 [1] : vector<2x4xf32> to vector<2xf32>
      %239 = vector.shape_cast %238 : vector<2xf32> to vector<2x1xf32>
      %240 = arith.mulf %234, %234 : vector<2x4x4xf32>
      %cst_146 = arith.constant dense<0.000000e+00> : vector<2x4xf32>
      %241 = vector.multi_reduction <add>, %240, %cst_146 [2] : vector<2x4x4xf32> to vector<2x4xf32>
      %cst_147 = arith.constant dense<0.000000e+00> : vector<2xf32>
      %242 = vector.multi_reduction <add>, %241, %cst_147 [1] : vector<2x4xf32> to vector<2xf32>
      %243 = vector.shape_cast %242 : vector<2xf32> to vector<2x1xf32>
      %244 = arith.mulf %235, %235 : vector<2x4x4xf32>
      %cst_148 = arith.constant dense<0.000000e+00> : vector<2x4xf32>
      %245 = vector.multi_reduction <add>, %244, %cst_148 [2] : vector<2x4x4xf32> to vector<2x4xf32>
      %cst_149 = arith.constant dense<0.000000e+00> : vector<2xf32>
      %246 = vector.multi_reduction <add>, %245, %cst_149 [1] : vector<2x4xf32> to vector<2xf32>
      %247 = vector.shape_cast %246 : vector<2xf32> to vector<2x1xf32>
      %248 = arith.mulf %243, %247 : vector<2x1xf32>
      %cst_150 = arith.constant 1.000000e-16 : f32
      %249 = vector.broadcast %cst_150 : f32 to vector<2x1xf32>
      %250 = arith.maximumf %248, %249 : vector<2x1xf32>
      %251 = math.rsqrt %250 : vector<2x1xf32>
      %252 = arith.mulf %239, %251 : vector<2x1xf32>
      %253 = vector.shape_cast %252 : vector<2x1xf32> to vector<1x2x1xf32>
      %cst_151 = arith.constant dense<0.000000e+00> : vector<1xf32>
      %254 = vector.multi_reduction <add>, %253, %cst_151 [1, 2] : vector<1x2x1xf32> to vector<1xf32>
      %255 = vector.shape_cast %254 : vector<1xf32> to vector<1x1x1xf32>
      %256 = vector.extract %255[0, 0, 0] : f32 from vector<1x1x1xf32>
      %cst_152 = arith.constant 5.000000e-01 : f32
      %257 = arith.mulf %256, %cst_152 : f32
      %258 = arith.subf %229, %257 : f32
      %cst_153 = arith.constant 2.500000e-01 : f32
      %259 = arith.mulf %cst_153, %258 : f32
      %260 = arith.addf %203, %259 : f32
      %cst_154 = arith.constant 0.333333343 : f32
      %261 = arith.mulf %260, %cst_154 : f32
      %c0_155 = arith.constant 0 : index
      %c0_156 = arith.constant 0 : index
      %262 = memref.load %arg12[%c0_155, %c0_156] : memref<1x1xf32, #tpu.memory_space<smem>>
      memref.store %261, %arg12[%c0_155, %c0_156] : memref<1x1xf32, #tpu.memory_space<smem>>
    } else {
    }
    return
  }
  func.func @transform_0(%arg0: i32) -> (i32, i32) {
    %c0_i32 = arith.constant 0 : i32
    %c0_i32_0 = arith.constant 0 : i32
    %c0_i32_1 = arith.constant 0 : i32
    return %c0_i32, %c0_i32_0 : i32, i32
  }
  func.func @transform_1(%arg0: i32) -> (i32, i32) {
    %c0_i32 = arith.constant 0 : i32
    %c0_i32_0 = arith.constant 0 : i32
    %c0_i32_1 = arith.constant 0 : i32
    return %c0_i32, %c0_i32_0 : i32, i32
  }
  func.func @transform_2(%arg0: i32) -> (i32, i32) {
    %c0_i32 = arith.constant 0 : i32
    %c0_i32_0 = arith.constant 0 : i32
    %c0_i32_1 = arith.constant 0 : i32
    return %c0_i32, %c0_i32_0 : i32, i32
  }
  func.func @transform_3(%arg0: i32) -> (i32, i32) {
    %c0_i32 = arith.constant 0 : i32
    %c0_i32_0 = arith.constant 0 : i32
    %c0_i32_1 = arith.constant 0 : i32
    return %c0_i32, %c0_i32_0 : i32, i32
  }
  func.func @transform_4(%arg0: i32) -> (i32, i32) {
    %c0_i32 = arith.constant 0 : i32
    %c0_i32_0 = arith.constant 0 : i32
    %c0_i32_1 = arith.constant 0 : i32
    return %c0_i32, %c0_i32_0 : i32, i32
  }
  func.func @transform_5(%arg0: i32) -> (i32, i32) {
    %c0_i32 = arith.constant 0 : i32
    %c0_i32_0 = arith.constant 0 : i32
    %c0_i32_1 = arith.constant 0 : i32
    return %c0_i32, %c0_i32_0 : i32, i32
  }
  func.func @transform_6(%arg0: i32) -> (i32, i32, i32) {
    %c0_i32 = arith.constant 0 : i32
    %c0_i32_0 = arith.constant 0 : i32
    %c0_i32_1 = arith.constant 0 : i32
    %c0_i32_2 = arith.constant 0 : i32
    return %c0_i32, %c0_i32_0, %c0_i32_1 : i32, i32, i32
  }
  func.func @transform_7(%arg0: i32) -> (i32, i32, i32) {
    %c0_i32 = arith.constant 0 : i32
    %c0_i32_0 = arith.constant 0 : i32
    %c0_i32_1 = arith.constant 0 : i32
    %c0_i32_2 = arith.constant 0 : i32
    return %c0_i32, %c0_i32_0, %c0_i32_1 : i32, i32, i32
  }
  func.func @transform_8(%arg0: i32) -> (i32, i32, i32) {
    %c0_i32 = arith.constant 0 : i32
    %c0_i32_0 = arith.constant 0 : i32
    %c0_i32_1 = arith.constant 0 : i32
    %c0_i32_2 = arith.constant 0 : i32
    return %c0_i32, %c0_i32_0, %c0_i32_1 : i32, i32, i32
  }
  func.func @transform_9(%arg0: i32) -> (i32, i32, i32) {
    %c0_i32 = arith.constant 0 : i32
    %c0_i32_0 = arith.constant 0 : i32
    %c0_i32_1 = arith.constant 0 : i32
    %c0_i32_2 = arith.constant 0 : i32
    return %c0_i32, %c0_i32_0, %c0_i32_1 : i32, i32, i32
  }
  func.func @transform_10(%arg0: i32) -> (i32, i32, i32) {
    %c0_i32 = arith.constant 0 : i32
    %c0_i32_0 = arith.constant 0 : i32
    %c0_i32_1 = arith.constant 0 : i32
    %c0_i32_2 = arith.constant 0 : i32
    return %c0_i32, %c0_i32_0, %c0_i32_1 : i32, i32, i32
  }
  func.func @transform_11(%arg0: i32) -> (i32, i32) {
    %c0_i32 = arith.constant 0 : i32
    %c0_i32_0 = arith.constant 0 : i32
    %c0_i32_1 = arith.constant 0 : i32
    return %c0_i32, %c0_i32_0 : i32, i32
  }
}

</mosaic_0001>

<bundles_post_ra>
// kernel: tpu_custom_call.1
= control target key start
LH: loop header
LB: loop body
LE: loop exit
PB: predicated region body
PF: predicated region fallthrough
CT: control target
= control target key end

     0   :  { %vm127_vm0 = vcmask 130048   ;;  %s1467_s0 = inlined_call_operand.vmem [shape: f32[8,128], index: 0, kind: input, shape index: {}]   ;;  %s1468_s1 = inlined_call_operand.vmem [shape: f32[8,128], index: 1, kind: input, shape index: {}]   ;;  %s1469_s2 = inlined_call_operand.vmem [shape: f32[8,128], index: 2, kind: input, shape index: {}]   ;;  %s1470_s3 = inlined_call_operand.vmem [shape: f32[8,128], index: 3, kind: input, shape index: {}]   ;;  %s1471_s4 = inlined_call_operand.vmem [shape: f32[8,128], index: 4, kind: input, shape index: {}]   ;;  %s1472_s5 = inlined_call_operand.vmem [shape: f32[8,128], index: 5, kind: input, shape index: {}]   ;;  %s1473_s6 = inlined_call_operand.vmem [shape: f32[4,16,16], index: 6, kind: input, shape index: {}]   ;;  %s1474_s7 = inlined_call_operand.vmem [shape: f32[4,16,8], index: 7, kind: input, shape index: {}]   ;;  %s1475_s8 = inlined_call_operand.vmem [shape: f32[4,8,16], index: 8, kind: input, shape index: {}]   ;;  %s1476_s9 = inlined_call_operand.vmem [shape: f32[4,16,4], index: 9, kind: input, shape index: {}]   ;;  %s1477_s10 = inlined_call_operand.vmem [shape: f32[4,4,16], index: 10, kind: input, shape index: {}]   ;;  %s1478_s11 = inlined_call_operand.hbm [shape: f32[1,1], index: 11, kind: output, shape index: {}]  }
   0x1   :  { %v357_v0 = vld [vmem:[%s1474_s7 + $0x8] sm:$0xff]  ;;  %v359_v1 = vld [vmem:[%s1474_s7 + $0x18] sm:$0xff]  ;;  %v356_v4 = vld [vmem:[%s1474_s7] sm:$0xff] }
   0x2   :  { %v361_v2 = vld [vmem:[%s1474_s7 + $0x28] sm:$0xff]  ;;  %384 = vmatpush.msra.mxu0 %v357_v0  ;;  %413 = vmatpush.msra.mxu1 %v359_v1  ;;  %v363_v3 = vld [vmem:[%s1474_s7 + $0x38] sm:$0xff]  ;;  %v358_v5 = vld [vmem:[%s1474_s7 + $0x10] sm:$0xff] }
   0x3   :  { %442 = vmatpush.msra.mxu2 %v361_v2  ;;  %471 = vmatpush.msra.mxu3 %v363_v3  ;;  %v360_v6 = vld [vmem:[%s1474_s7 + $0x20] sm:$0xff]  ;;  %v362_v7 = vld [vmem:[%s1474_s7 + $0x30] sm:$0xff] }
   0x4   :  { %v91_v8 = vld [vmem:[%s1471_s4] sm:$0xff]  ;;  %385 = vmatpush.msra.mxu0 %v356_v4  ;;  %414 = vmatpush.msra.mxu1 %v358_v5  ;;  %v1174_v15 = vld [vmem:[%s1473_s6 + $0x10] sm:$0xff] }
   0x5   :  { %v92_v9 = vld [vmem:[%s1472_s5] sm:$0xff]  ;;  %443 = vmatpush.msra.mxu2 %v360_v6  ;;  %472 = vmatpush.msra.mxu3 %v362_v7  ;;  %v1188_v17 = vld [vmem:[%s1473_s6 + $0x30] sm:$0xff] }
   0x6   :  { %v47_v10 = vld [vmem:[%s1467_s0] sm:$0xff]  ;;  %v95_v12 = vmul.f32 %v92_v9, %v91_v8  ;;  %1004 = vmatmul.msk.f32.vlgmr.msra.gmra.mxu1 %vm127_vm0, %v1174_v15  ;;  %1008 = vmatmul.msk.f32.vlgmr.msra.gmra.mxu3 %vm127_vm0, %v1188_v17 }
   0x7   :  { %v48_v11 = vld [vmem:[%s1468_s1] sm:$0xff] }
   0x8   :  { %v50_v13 = vmul.f32 %v48_v11, %v47_v10  ;;  %v1169_v14 = vld [vmem:[%s1473_s6] sm:$0xff]  ;;  %96 = vadd.xlane.f32.xlu1 %v95_v12 }
   0x9   :  { %v1179_v16 = vld [vmem:[%s1473_s6 + $0x20] sm:$0xff]  ;;  %1002 = vmatmul.msk.f32.vlgmr.msra.gmra.mxu0 %vm127_vm0, %v1169_v14 }
   0xa   :  { %v70_v18 = vld [vmem:[%s1469_s2] sm:$0xff]  ;;  %51 = vadd.xlane.f32.xlu0 %v50_v13  ;;  %1006 = vmatmul.msk.f32.vlgmr.msra.gmra.mxu2 %vm127_vm0, %v1179_v16 }
   0xb   :  { %v80_v19 = vmul.f32 %v70_v18, %v70_v18  ;;  %v71_v20 = vld [vmem:[%s1470_s3] sm:$0xff] }
   0xc   :  { %16 = vsyncpa [#allocation4], 0  ;;  %v74_v21 = vmul.f32 %v71_v20, %v70_v18  ;;  %v1203_v22 = vld [vmem:[%s1473_s6 + $0x8] sm:$0xff]  ;;  %v1208_v23 = vld [vmem:[%s1473_s6 + $0x18] sm:$0xff]  ;;  %v57_v24 = vmul.f32 %v47_v10, %v47_v10  ;;  %v101_v27 = vmul.f32 %v91_v8, %v91_v8  ;;  %v64_v28 = vmul.f32 %v48_v11, %v48_v11  ;;  %s992_s14 = sshll.u32 %s1478_s11, 4  ;;  %s993_s14 = int_to_ptr.hbm [resolvable:$true] %s992_s14 }
   0xd   :  { %81 = vadd.xlane.f32.xlu2 %v80_v19  ;;  %v1213_v25 = vld [vmem:[%s1473_s6 + $0x28] sm:$0xff]  ;;  %v1218_v26 = vld [vmem:[%s1473_s6 + $0x38] sm:$0xff]  ;;  %v86_v29 = vmul.f32 %v71_v20, %v71_v20  ;;  %v107_v30 = vmul.f32 %v92_v9, %v92_v9  ;;  %v161_v31 = vmul.f32 %v1169_v14, %v1169_v14  ;;  %v162_v32 = vmul.f32 %v1203_v22, %v1203_v22  ;;  %s1069_s6 = smov [#allocation3]  }
   0xe   :  { %1005 = vmatmul.msk.f32.gmra.mxu1 %vm127_vm0, %v1208_v23  ;;  %1009 = vmatmul.msk.f32.gmra.mxu3 %vm127_vm0, %v1218_v26  ;;  %v163_v33 = vmul.f32 %v1174_v15, %v1174_v15  ;;  %v164_v37 = vmul.f32 %v1208_v23, %v1208_v23  ;;  %vm43_vm1 = vcmask 23552   ;;  %v1067_v39 = vmov 0.0  }
   0xf   :  { %v165_v34 = vsel %vm127_vm0, %v161_v31, 0.0  ;;  %v168_v35 = vsel %vm127_vm0, %v162_v32, 0.0  ;;  %46 = vst.msk [vmem:[#allocation2 + $0x10] sm:$0xff] %vm43_vm1, %v1067_v39  ;;  %v192_v40 = vmul.f32 %v1179_v16, %v1179_v16  ;;  %v193_v42 = vmul.f32 %v1213_v25, %v1213_v25  ;;  %v709_v31 = vld [vmem:[%s1476_s9 + $0x8] sm:$0xff]  ;;  %v711_v32 = vld [vmem:[%s1476_s9 + $0x18] sm:$0xff] }
  0x10   :  { %58 = vadd.xlane.f32.xlu1 %v57_v24  ;;  %v171_v36 = vsel %vm127_vm0, %v163_v33, 0.0  ;;  %v174_v38 = vsel %vm127_vm0, %v164_v37, 0.0  ;;  %44 = vst.msk [vmem:[#allocation2] sm:$0xff] %vm43_vm1, %v1067_v39  ;;  %v195_v43 = vmul.f32 %v1218_v26, %v1218_v26  ;;  %v124_v48 = vmul.f32 %v1213_v25, %v1203_v22  ;;  %v708_v37 = vld [vmem:[%s1476_s9] sm:$0xff] }
  0x11   :  { %1003 = vmatmul.msk.f32.gmra.mxu0 %vm127_vm0, %v1203_v22  ;;  %45 = vst.msk [vmem:[#allocation2 + $0x8] sm:$0xff] %vm43_vm1, %v1067_v39  ;;  %v196_v41 = vsel %vm127_vm0, %v192_v40, 0.0  ;;  %v199_v44 = vsel %vm127_vm0, %v193_v42, 0.0  ;;  %v123_v49 = vmul.f32 %v1179_v16, %v1169_v14  ;;  %vm54_vm2 = vcmask 7168  }
  0x12   :  { %75 = vadd.xlane.f32.xlu0 %v74_v21  ;;  %1007 = vmatmul.msk.f32.gmra.mxu2 %vm127_vm0, %v1213_v25  ;;  %v205_v45 = vsel %vm127_vm0, %v195_v43, 0.0  ;;  %v131_v54 = vsel %vm127_vm0, %v124_v48, 0.0  ;;  %v194_v57 = vmul.f32 %v1188_v17, %v1188_v17  ;;  %v126_v59 = vmul.f32 %v1218_v26, %v1208_v23  ;;  %v482_v43 = vld [vmem:[%s1475_s8 + $0x10] sm:$0xff]  ;;  %v715_v48 = vld [vmem:[%s1476_s9 + $0x38] sm:$0xff] }
  0x13   :  { %v128_v56 = vsel %vm127_vm0, %v123_v49, 0.0  ;;  %vm61_vm3 = vcmask 15368   ;;  %v125_v8 = vmul.f32 %v1188_v17, %v1174_v15  ;;  %v144_v18 = vlaneseq }
  0x14   :  { %v202_v60 = vsel %vm127_vm0, %v194_v57, 0.0  ;;  %v137_v63 = vsel %vm127_vm0, %v126_v59, 0.0  ;;  %vm68_vm4 = vcmask 23568   ;;  %vm248_vm5 = vcmask 19456  }
  0x15   :  { %102 = vadd.xlane.f32.xlu2 %v101_v27  ;;  %v134_v9 = vsel %vm127_vm0, %v125_v8, 0.0  ;;  %v480_v27 = vld [vmem:[%s1475_s8] sm:$0xff]  ;;  %vm149_vm6 = vcmask 130112   ;;  %vm154_vm7 = vcmask 1041409   ;;  %vm157_vm8 = vcmask 123904  }
  0x16   :  { %v94_v46 = vld [vmem:[#allocation2 + $0x10] sm:$0xff]  ;;  %vm266_vm9 = vcmask 1040384  }
  0x17   :  { %v49_v47 = vld [vmem:[#allocation2] sm:$0xff] }
  0x18   :  { %87 = vadd.xlane.f32.xlu1 %v86_v29  ;;  %v73_v58 = vld [vmem:[#allocation2 + $0x8] sm:$0xff] }
  0x1a   :  { %65 = vadd.xlane.f32.xlu0 %v64_v28  ;;  %v481_v28 = vld [vmem:[%s1475_s8 + $0x8] sm:$0xff] }
  0x1d   :  { %108 = vadd.xlane.f32.xlu2 %v107_v30 }
  0x20   :  { %169 = vadd.xlane.f32.xlu1 %v168_v35  ;;  %v1282_v35 = vand.u32 127, %v144_v18 }
  0x22   :  { %166 = vadd.xlane.f32.xlu0 %v165_v34  ;;  %v1295_v42 = vadd.s32 4294967288, %v1282_v35 }
  0x25   :  { %172 = vadd.xlane.f32.xlu2 %v171_v36 }
  0x28   :  { %197 = vadd.xlane.f32.xlu1 %v196_v41 }
  0x2a   :  { %175 = vadd.xlane.f32.xlu0 %v174_v38  ;;  %v710_v38 = vld [vmem:[%s1476_s9 + $0x10] sm:$0xff] }
  0x2d   :  { %200 = vadd.xlane.f32.xlu2 %v199_v44  ;;  %v483_v44 = vld [vmem:[%s1475_s8 + $0x18] sm:$0xff] }
  0x30   :  { %206 = vadd.xlane.f32.xlu1 %v205_v45 }
  0x32   :  { %203 = vadd.xlane.f32.xlu0 %v202_v60 }
  0x35   :  { %132 = vadd.xlane.f32.xlu2 %v131_v54  ;;  %v714_v54 = vld [vmem:[%s1476_s9 + $0x30] sm:$0xff] }
  0x38   :  { %129 = vadd.xlane.f32.xlu1 %v128_v56 }
  0x3a   :  { %135 = vadd.xlane.f32.xlu0 %v134_v9 }
  0x40   :  { %138 = vadd.xlane.f32.xlu1 %v137_v63 }
  0x7b   :  { %v97_v50 = vpop.xlane.xlu1 %96 }
  0x7c   :  { %v98_v52 = vadd.f32 %v97_v50, %v94_v46 }
  0x7d   :  { %v52_v51 = vpop.xlane.xlu0 %51 }
  0x7e   :  { %v53_v53 = vadd.f32 %v52_v51, %v49_v47  ;;  %99 = vst.msk [vmem:[#allocation2 + $0x10] sm:$0xff] %vm54_vm2, %v98_v52  ;;  %v713_v47 = vld [vmem:[%s1476_s9 + $0x28] sm:$0xff] }
  0x80   :  { %v82_v55 = vpop.xlane.xlu2 %81  ;;  %55 = vst.msk [vmem:[#allocation2] sm:$0xff] %vm54_vm2, %v53_v53  ;;  %v712_v53 = vld [vmem:[%s1476_s9 + $0x20] sm:$0xff]  ;;  %s1068_s9 = smov 127  }
  0x83   :  { %v59_v62 = vpop.xlane.xlu1 %58  ;;  %v416_v2 = vpop.f32.mrf.mxu1 }
  0x85   :  { %v76_v61 = vpop.xlane.xlu0 %75  ;;  %v100_v4 = vld [vmem:[#allocation2 + $0x10] sm:$0xff] }
  0x86   :  { %v77_v0 = vadd.f32 %v76_v61, %v73_v58  ;;  %v387_v1 = vpop.f32.mrf.mxu0 }
  0x87   :  { %v56_v6 = vld [vmem:[#allocation2] sm:$0xff] }
  0x88   :  { %v103_v3 = vpop.xlane.xlu2 %102  ;;  %78 = vst.msk [vmem:[#allocation2 + $0x8] sm:$0xff] %vm54_vm2, %v77_v0  ;;  %v60_v7 = vadd.f32 %v59_v62, %v56_v6 }
  0x89   :  { %v104_v5 = vadd.f32 %v103_v3, %v100_v4  ;;  %v474_v13 = vpop.f32.mrf.mxu3 }
  0x8a   :  { %62 = vst.msk [vmem:[#allocation2] sm:$0xff] %vm61_vm3, %v60_v7 }
  0x8b   :  { %105 = vst.msk [vmem:[#allocation2 + $0x10] sm:$0xff] %vm61_vm3, %v104_v5  ;;  %v88_v11 = vpop.xlane.xlu1 %87  ;;  %v419_v20 = vpop.f32.mrf.mxu1 }
  0x8c   :  { %524 = vmatpush.msrb.mxu1 %v419_v20 }
  0x8d   :  { %v66_v10 = vpop.xlane.xlu0 %65  ;;  %v445_v12 = vpop.f32.mrf.mxu2 }
  0x8e   :  { %v390_v19 = vpop.f32.mrf.mxu0  ;;  %525 = vmatpush.msrb.mxu1 %v416_v2 }
  0x8f   :  { %v79_v21 = vld [vmem:[#allocation2 + $0x8] sm:$0xff]  ;;  %501 = vmatpush.msrb.mxu0 %v390_v19  ;;  %1011 = vmatmul.msk.f32.vlgmr.msrb.gmra.mxu1 %vm127_vm0, %v481_v28 }
  0x90   :  { %v109_v24 = vpop.xlane.xlu2 %108  ;;  %v83_v29 = vadd.f32 %v82_v55, %v79_v21  ;;  %753 = vmatpush.msra.mxu1 %v711_v32 }
  0x91   :  { %v63_v34 = vld [vmem:[#allocation2] sm:$0xff]  ;;  %502 = vmatpush.msrb.mxu0 %v387_v1  ;;  %v477_v41 = vpop.f32.mrf.mxu3 }
  0x92   :  { %v106_v30 = vld [vmem:[#allocation2 + $0x10] sm:$0xff]  ;;  %84 = vst.msk [vmem:[#allocation2 + $0x8] sm:$0xff] %vm61_vm3, %v83_v29  ;;  %v67_v36 = vadd.f32 %v66_v10, %v63_v34  ;;  %1010 = vmatmul.msk.f32.vlgmr.msrb.gmra.mxu0 %vm127_vm0, %v480_v27  ;;  %754 = vmatpush.msra.mxu1 %v710_v38 }
  0x93   :  { %v110_v33 = vadd.f32 %v109_v24, %v106_v30  ;;  %730 = vmatpush.msra.mxu0 %v709_v31  ;;  %570 = vmatpush.msrb.mxu3 %v477_v41  ;;  %v170_v45 = vpop.xlane.xlu1 %169 }
  0x94   :  { %69 = vst.msk [vmem:[#allocation2] sm:$0xff] %vm68_vm4, %v67_v36  ;;  %v182_v52 = vperm.slane %v170_v45, %v1295_v42 }
  0x95   :  { %111 = vst.msk [vmem:[#allocation2 + $0x10] sm:$0xff] %vm68_vm4, %v110_v33  ;;  %v167_v39 = vpop.xlane.xlu0 %166  ;;  %v448_v40 = vpop.f32.mrf.mxu2  ;;  %731 = vmatpush.msra.mxu0 %v708_v37  ;;  %571 = vmatpush.msrb.mxu3 %v474_v13 }
  0x96   :  { %547 = vmatpush.msrb.mxu2 %v448_v40  ;;  %v181_v51 = vperm.slane %v167_v39, %v1282_v35  ;;  %1013 = vmatmul.msk.f32.vlgmr.msrb.gmra.mxu3 %vm127_vm0, %v483_v44 }
  0x97   :  { %1016 = vmatmul.msk.f32.vlgmr.msra.gmra.mxu1 %vm127_vm0, %v1174_v15  ;;  %799 = vmatpush.msra.mxu3 %v715_v48 }
  0x98   :  { %548 = vmatpush.msrb.mxu2 %v445_v12  ;;  %v173_v49 = vpop.xlane.xlu2 %172  ;;  %v183_v63 = vsel %vm149_vm6, %v182_v52, %v181_v51 }
  0x99   :  { %v85_v46 = vld [vmem:[#allocation2 + $0x8] sm:$0xff]  ;;  %1012 = vmatmul.msk.f32.vlgmr.msrb.gmra.mxu2 %vm127_vm0, %v482_v43  ;;  %v184_v56 = vperm.slane %v173_v49, %v1282_v35  ;;  %800 = vmatpush.msra.mxu3 %v714_v54 }
  0x9a   :  { %v89_v50 = vadd.f32 %v88_v11, %v85_v46  ;;  %1014 = vmatmul.msk.f32.vlgmr.msra.gmra.mxu0 %vm127_vm0, %v1169_v14  ;;  %776 = vmatpush.msra.mxu2 %v713_v47 }
  0x9b   :  { %v247_v15 = vld [vmem:[#allocation2] sm:$0xff] }
  0x9c   :  { %v656_v55 = vld [vmem:[#allocation2 + $0x10] sm:$0xff]  ;;  %90 = vst.msk [vmem:[#allocation2 + $0x8] sm:$0xff] %vm68_vm4, %v89_v50  ;;  %v249_v60 = vsel %vm248_vm5, %v247_v15, 0.0  ;;  %v257_v61 = vrot.slane %v247_v15, 4  ;;  %777 = vmatpush.msra.mxu2 %v712_v53  ;;  %vm578_vm4 = vcmask 64512  }
  0x9d   :  { %v657_v14 = vsel %vm248_vm5, %v656_v55, 0.0  ;;  %v665_v57 = vrot.slane %v656_v55, 4  ;;  %v176_v58 = vpop.xlane.xlu0 %175  ;;  %v250_v1 = vrot.slane %v249_v60, 4 }
  0x9e   :  { %v658_v59 = vrot.slane %v657_v14, 4  ;;  %v185_v62 = vperm.slane %v176_v58, %v1295_v42  ;;  %v259_v4 = vsel %vm248_vm5, %v257_v61, 0.0  ;;  %1020 = vmatmul.msk.f32.vlgmr.msra.gmra.mxu3 %vm127_vm0, %v1188_v17 }
  0x9f   :  { %v667_v0 = vsel %vm248_vm5, %v665_v57, 0.0  ;;  %v251_v6 = vadd.f32 %v250_v1, %v249_v60  ;;  %v260_v7 = vrot.slane %v259_v4, 4  ;;  %1017 = vmatmul.msk.f32.gmra.mxu1 %vm127_vm0, %v1208_v23 }
  0xa0   :  { %v659_v2 = vadd.f32 %v658_v59, %v657_v14  ;;  %v668_v3 = vrot.slane %v667_v0, 4  ;;  %v186_v5 = vsel %vm149_vm6, %v185_v62, %v184_v56 }
  0xa1   :  { %v187_v8 = vsel %vm154_vm7, %v186_v5, %v183_v63  ;;  %1018 = vmatmul.msk.f32.vlgmr.msra.gmra.mxu2 %vm127_vm0, %v1179_v16  ;;  %v252_v12 = vrot.slane %v251_v6, 2  ;;  %v261_v13 = vadd.f32 %v260_v7, %v259_v4 }
  0xa2   :  { %v660_v9 = vrot.slane %v659_v2, 2  ;;  %v669_v10 = vadd.f32 %v668_v3, %v667_v0  ;;  %v189_v11 = vsel %vm157_vm8, %v187_v8, 0.0  ;;  %1015 = vmatmul.msk.f32.gmra.mxu0 %vm127_vm0, %v1203_v22 }
  0xa3   :  { %v304_v20 = vld [vmem:[#allocation2 + $0x8] sm:$0xff]  ;;  %190 = vadd.xlane.f32.xlu2 %v189_v11  ;;  %v253_v21 = vadd.f32 %v252_v12, %v251_v6  ;;  %v262_v24 = vrot.slane %v261_v13, 2 }
  0xa4   :  { %v661_v18 = vadd.f32 %v660_v9, %v659_v2  ;;  %v670_v19 = vrot.slane %v669_v10, 2  ;;  %v305_v16 = vsel %vm248_vm5, %v304_v20, 0.0  ;;  %v313_v27 = vrot.slane %v304_v20, 4 }
  0xa5   :  { %v306_v29 = vrot.slane %v305_v16, 4  ;;  %v254_v30 = vrot.slane %v253_v21, 1  ;;  %v263_v31 = vadd.f32 %v262_v24, %v261_v13 }
  0xa6   :  { %v662_v17 = vrot.slane %v661_v18, 1  ;;  %v671_v28 = vadd.f32 %v670_v19, %v669_v10  ;;  %v315_v32 = vsel %vm248_vm5, %v313_v27, 0.0  ;;  %1021 = vmatmul.msk.f32.gmra.mxu3 %vm127_vm0, %v1218_v26  ;;  %vm906_vm5 = vcmask 27648  }
  0xa7   :  { %v307_v34 = vadd.f32 %v306_v29, %v305_v16  ;;  %v316_v23 = vrot.slane %v315_v32, 4  ;;  %v255_v36 = vadd.f32 %v254_v30, %v253_v21  ;;  %v264_v37 = vrot.slane %v263_v31, 1 }
  0xa8   :  { %v663_v22 = vadd.f32 %v662_v17, %v661_v18  ;;  %v672_v33 = vrot.slane %v671_v28, 1 }
  0xa9   :  { %v308_v39 = vrot.slane %v307_v34, 2  ;;  %v317_v40 = vadd.f32 %v316_v23, %v315_v32  ;;  %1019 = vmatmul.msk.f32.gmra.mxu2 %vm127_vm0, %v1213_v25  ;;  %v265_v41 = vadd.f32 %v264_v37, %v263_v31 }
  0xaa   :  { %v673_v38 = vadd.f32 %v672_v33, %v671_v28  ;;  %v809_v33 = vld [vmem:[%s1477_s10 + $0x4] sm:$0xf] }
  0xab   :  { %v309_v44 = vadd.f32 %v308_v39, %v307_v34  ;;  %v318_v45 = vrot.slane %v317_v40, 2  ;;  %v1353_v47 = vsel %vm266_vm9, %v255_v36, %v265_v41  ;;  %v811_v41 = vld [vmem:[%s1477_s10 + $0xc] sm:$0xf] }
  0xac   :  { %v1349_v43 = vsel %vm266_vm9, %v663_v22, %v673_v38  ;;  %v268_v48 = vmax.f32 %v1353_v47, 1e-24  ;;  %v808_v22 = vld [vmem:[%s1477_s10] sm:$0xf] }
  0xad   :  { %v675_v46 = vmax.f32 %v1349_v43, 1e-24  ;;  %v310_v49 = vrot.slane %v309_v44, 1  ;;  %v319_v50 = vadd.f32 %v318_v45, %v317_v40  ;;  %v810_v40 = vld [vmem:[%s1477_s10 + $0x8] sm:$0xf]  ;;  %v201_v45 = vpop.xlane.xlu2 %200 }
  0xae   :  { %vm275_vm12 = vweird.f32 %v268_v48 }
  0xaf   :  { %1041 = vrsqrt.f32 %v675_v46  ;;  %v311_v25 = vadd.f32 %v310_v49, %v309_v44  ;;  %v320_v51 = vrot.slane %v319_v50, 1  ;;  %vm682_vm10 = vweird.f32 %v675_v46  ;;  %v198_v44 = vpop.xlane.xlu1 %197 }
  0xb0   :  { %1043 = vrsqrt.f32 %v268_v48 }
  0xb1   :  { %v321_v26 = vadd.f32 %v320_v51, %v319_v50 }
  0xb3   :  { %v1357_v52 = vsel %vm266_vm9, %v311_v25, %v321_v26  ;;  %v204_v26 = vpop.xlane.xlu0 %203 }
  0xb4   :  { %v323_v54 = vmax.f32 %v1357_v52, 1e-24 }
  0xb5   :  { %v1042_v53 = vpop.eup %1041 }
  0xb6   :  { %v1044_v55 = vpop.eup %1043  ;;  %v677_v56 = vmul.f32 %v1042_v53, %v675_v46  ;;  %1045 = vrsqrt.f32 %v323_v54  ;;  %vm683_vm11 = vweird.f32 %v1042_v53  ;;  %vm330_vm1 = vweird.f32 %v323_v54 }
  0xb7   :  { %v270_v14 = vmul.f32 %v1044_v55, %v268_v48  ;;  %vm276_vm13 = vweird.f32 %v1044_v55  ;;  %vm684_vm14 = vmor %vm682_vm10, %vm683_vm11  ;;  %v207_v46 = vpop.xlane.xlu1 %206  ;;  %v133_v48 = vpop.xlane.xlu2 %132  ;;  %vm236_vm11 = vcmask 1024  }
  0xb8   :  { %v678_v57 = vmul.f32 %v1042_v53, %v677_v56  ;;  %vm277_vm15 = vmor %vm275_vm12, %vm276_vm13 }
  0xb9   :  { %v271_v15 = vmul.f32 %v1044_v55, %v270_v14 }
  0xba   :  { %v679_v58 = vmul.f32 0.5, %v678_v57 }
  0xbb   :  { %v272_v59 = vmul.f32 0.5, %v271_v15 }
  0xbc   :  { %v680_v60 = vsub.f32 1.5, %v679_v58  ;;  %v1046_v61 = vpop.eup %1045 }
  0xbd   :  { %v273_v62 = vsub.f32 1.5, %v272_v59  ;;  %v325_v0 = vmul.f32 %v1046_v61, %v323_v54  ;;  %vm331_vm2 = vweird.f32 %v1046_v61 }
  0xbe   :  { %v681_v63 = vmul.f32 %v1042_v53, %v680_v60  ;;  %vm332_vm3 = vmor %vm330_vm1, %vm331_vm2 }
  0xbf   :  { %v274_v1 = vmul.f32 %v1044_v55, %v273_v62  ;;  %v326_v3 = vmul.f32 %v1046_v61, %v325_v0  ;;  %v130_v49 = vpop.xlane.xlu1 %129  ;;  %v213_v62 = vperm.slane %v201_v45, %v1295_v42 }
  0xc0   :  { %v1360_v2 = vsel %vm684_vm14, %v1042_v53, %v681_v63 }
  0xc1   :  { %687 = vrot.lane.b32.xlu0 %v1360_v2, %s1068_s9  ;;  %v1364_v4 = vsel %vm277_vm15, %v1044_v55, %v274_v1  ;;  %v327_v5 = vmul.f32 0.5, %v326_v3  ;;  %v136_v55 = vpop.xlane.xlu0 %135  ;;  %v212_v3 = vperm.slane %v198_v44, %v1282_v35 }
  0xc2   :  { %280 = vrot.lane.b32.xlu1 %v1364_v4, %s1068_s9 }
  0xc3   :  { %v328_v6 = vsub.f32 1.5, %v327_v5  ;;  %v216_v5 = vperm.slane %v207_v46, %v1295_v42 }
  0xc5   :  { %v329_v7 = vmul.f32 %v1046_v61, %v328_v6  ;;  %v215_v6 = vperm.slane %v204_v26, %v1282_v35 }
  0xc7   :  { %v1368_v8 = vsel %vm332_vm3, %v1046_v61, %v329_v7  ;;  %v139_v25 = vpop.xlane.xlu1 %138 }
  0xc8   :  { %335 = vrot.lane.b32.xlu2 %v1368_v8, %s1068_s9 }
 0x10c   :  { %v527_v10 = vpop.f32.mrf.mxu1 }
 0x10d   :  { %v596_v12 = vmul.f32 %v527_v10, %v527_v10 }
 0x10f   :  { %v504_v9 = vpop.f32.mrf.mxu0  ;;  %v600_v13 = vsel %vm578_vm4, %v596_v12, 0.0 }
 0x110   :  { %v595_v11 = vmul.f32 %v504_v9, %v504_v9  ;;  %601 = vadd.xlane.f32.xlu0 %v600_v13  ;;  %v214_v13 = vsel %vm149_vm6, %v213_v62, %v212_v3 }
 0x112   :  { %v597_v18 = vsel %vm578_vm4, %v595_v11, 0.0 }
 0x113   :  { %598 = vadd.xlane.f32.xlu2 %v597_v18  ;;  %v217_v18 = vsel %vm149_vm6, %v216_v5, %v215_v6 }
 0x114   :  { %v756_v20 = vpop.f32.mrf.mxu1 }
 0x116   :  { %v1394_v50 = vpop.xlane.xlu2 %190 }
 0x117   :  { %v733_v19 = vpop.f32.mrf.mxu0 }
 0x119   :  { %v573_v24 = vpop.f32.mrf.mxu3 }
 0x11a   :  { %v577_v27 = vmul.f32 %v573_v24, %v527_v10  ;;  %v613_v17 = vmul.f32 %v573_v24, %v573_v24  ;;  %v146_v24 = vperm.slane %v130_v49, %v1282_v35 }
 0x11c   :  { %v550_v21 = vpop.f32.mrf.mxu2  ;;  %v759_v29 = vpop.f32.mrf.mxu1  ;;  %v582_v30 = vsel %vm578_vm4, %v577_v27, 0.0  ;;  %v617_v31 = vsel %vm578_vm4, %v613_v17, 0.0  ;;  %v151_v27 = vperm.slane %v136_v55, %v1282_v35 }
 0x11d   :  { %v612_v16 = vmul.f32 %v550_v21, %v550_v21  ;;  %583 = vadd.xlane.f32.xlu0 %v582_v30  ;;  %618 = vadd.xlane.f32.xlu2 %v617_v31  ;;  %v576_v34 = vmul.f32 %v550_v21, %v504_v9  ;;  %v148_v21 = vperm.slane %v133_v48, %v1295_v42 }
 0x11e   :  { %852 = vmatpush.msrb.mxu1 %v759_v29 }
 0x11f   :  { %v736_v28 = vpop.f32.mrf.mxu0  ;;  %v614_v32 = vsel %vm578_vm4, %v612_v16, 0.0  ;;  %v579_v37 = vsel %vm578_vm4, %v576_v34, 0.0  ;;  %v152_v16 = vperm.slane %v139_v25, %v1295_v42  ;;  %v150_v29 = vsel %vm149_vm6, %v148_v21, %v146_v24 }
 0x120   :  { %615 = vadd.xlane.f32.xlu1 %v614_v32  ;;  %829 = vmatpush.msrb.mxu0 %v736_v28 }
 0x121   :  { %853 = vmatpush.msrb.mxu1 %v756_v20  ;;  %v802_v36 = vpop.f32.mrf.mxu3  ;;  %v218_v20 = vsel %vm154_vm7, %v217_v18, %v214_v13  ;;  %v153_v30 = vsel %vm149_vm6, %v152_v16, %v151_v27  ;;  %vm919_vm6 = vcmask 25600  }
 0x122   :  { %830 = vmatpush.msrb.mxu0 %v733_v19  ;;  %1023 = vmatmul.msk.f32.vlgmr.msrb.gmra.mxu1 %vm127_vm0, %v809_v33  ;;  %v1396_v51 = vpop.permute.xlu2 %335  ;;  %v220_v28 = vsel %vm157_vm8, %v218_v20, 0.0  ;;  %v155_v31 = vsel %vm154_vm7, %v153_v30, %v150_v29 }
 0x123   :  { %1022 = vmatmul.msk.f32.vlgmr.msrb.gmra.mxu0 %vm127_vm0, %v808_v22  ;;  %v158_v42 = vsel %vm157_vm8, %v155_v31, 0.0  ;;  %v338_v3 = vmul.f32 %v1396_v51, %v1368_v8 }
 0x124   :  { %v779_v23 = vpop.f32.mrf.mxu2 }
 0x125   :  { %580 = vadd.xlane.f32.xlu2 %v579_v37 }
 0x129   :  { %v805_v39 = vpop.f32.mrf.mxu3 }
 0x12a   :  { %898 = vmatpush.msrb.mxu3 %v805_v39 }
 0x12c   :  { %v782_v38 = vpop.f32.mrf.mxu2  ;;  %899 = vmatpush.msrb.mxu3 %v802_v36 }
 0x12d   :  { %875 = vmatpush.msrb.mxu2 %v782_v38  ;;  %1025 = vmatmul.msk.f32.vlgmr.msrb.gmra.mxu3 %vm127_vm0, %v811_v41 }
 0x12f   :  { %876 = vmatpush.msrb.mxu2 %v779_v23 }
 0x130   :  { %1024 = vmatmul.msk.f32.vlgmr.msrb.gmra.mxu2 %vm127_vm0, %v810_v40  ;;  %vm591_vm0 = vcmask 58368  }
 0x133   :  { %v688_v60 = vpop.permute.xlu0 %687 }
 0x134   :  { %v1398_v54 = vpop.permute.xlu1 %280  ;;  %v690_v25 = vmul.f32 %v688_v60, %v1360_v2 }
 0x183   :  { %v602_v63 = vpop.xlane.xlu0 %601 }
 0x184   :  { %v606_v10 = vperm.slane %v602_v63, %v1282_v35 }
 0x186   :  { %v599_v53 = vpop.xlane.xlu2 %598 }
 0x187   :  { %v605_v11 = vperm.slane %v599_v53, %v1282_v35 }
 0x189   :  { %v607_v19 = vsel %vm154_vm7, %v606_v10, %v605_v11  ;;  %v283_v10 = vmul.f32 %v1398_v54, %v1364_v4 }
 0x18a   :  { %v609_v17 = vsel %vm591_vm0, %v607_v19, 0.0 }
 0x190   :  { %v619_v56 = vpop.xlane.xlu2 %618  ;;  %v584_v41 = vpop.xlane.xlu0 %583 }
 0x191   :  { %v623_v14 = vperm.slane %v619_v56, %v1282_v35  ;;  %v588_v46 = vperm.slane %v584_v41, %v1282_v35 }
 0x193   :  { %v616_v57 = vpop.xlane.xlu1 %615 }
 0x194   :  { %v622_v15 = vperm.slane %v616_v57, %v1282_v35 }
 0x196   :  { %v624_v58 = vsel %vm154_vm7, %v623_v14, %v622_v15 }
 0x197   :  { %v626_v59 = vsel %vm591_vm0, %v624_v58, 0.0 }
 0x198   :  { %627 = vadd.xlane.f32.xlu2 %v626_v59  ;;  %v581_v40 = vpop.xlane.xlu2 %580 }
 0x199   :  { %v587_v45 = vperm.slane %v581_v40, %v1282_v35 }
 0x19b   :  { %v589_v48 = vsel %vm154_vm7, %v588_v46, %v587_v45 }
 0x19c   :  { %v592_v49 = vsel %vm591_vm0, %v589_v48, 0.0 }
 0x19f   :  { %v855_v1 = vpop.f32.mrf.mxu1 }
 0x1a0   :  { %v832_v61 = vpop.f32.mrf.mxu0  ;;  %v924_v7 = vmul.f32 %v855_v1, %v855_v1 }
 0x1a1   :  { %v923_v0 = vmul.f32 %v832_v61, %v832_v61 }
 0x1a2   :  { %v928_v12 = vsel %vm906_vm5, %v924_v7, 0.0 }
 0x1a3   :  { %v925_v9 = vsel %vm906_vm5, %v923_v0, 0.0  ;;  %929 = vadd.xlane.f32.xlu1 %v928_v12 }
 0x1a4   :  { %926 = vadd.xlane.f32.xlu0 %v925_v9 }
 0x1ab   :  { %221 = vadd.xlane.f32.xlu1 %v220_v28 }
 0x1ac   :  { %610 = vadd.xlane.f32.xlu0 %v609_v17 }
 0x1b0   :  { %v901_v22 = vpop.f32.mrf.mxu3 }
 0x1b1   :  { %v941_v34 = vmul.f32 %v901_v22, %v901_v22  ;;  %v905_v39 = vmul.f32 %v901_v22, %v855_v1 }
 0x1b3   :  { %v878_v32 = vpop.f32.mrf.mxu2  ;;  %159 = vadd.xlane.f32.xlu1 %v158_v42  ;;  %v945_v23 = vsel %vm906_vm5, %v941_v34, 0.0  ;;  %v910_v44 = vsel %vm906_vm5, %v905_v39, 0.0 }
 0x1b4   :  { %v940_v33 = vmul.f32 %v878_v32, %v878_v32  ;;  %946 = vadd.xlane.f32.xlu0 %v945_v23  ;;  %v904_v37 = vmul.f32 %v878_v32, %v832_v61 }
 0x1b6   :  { %v942_v36 = vsel %vm906_vm5, %v940_v33, 0.0  ;;  %v907_v38 = vsel %vm906_vm5, %v904_v37, 0.0 }
 0x1b7   :  { %943 = vadd.xlane.f32.xlu2 %v942_v36 }
 0x1bc   :  { %908 = vadd.xlane.f32.xlu0 %v907_v38 }
 0x1c4   :  { %911 = vadd.xlane.f32.xlu0 %v910_v44 }
 0x1cc   :  { %593 = vadd.xlane.f32.xlu0 %v592_v49 }
 0x1e0   :  { %692 = vrot.lane.b32.xlu0 %v690_v25, %s1068_s9 }
 0x20b   :  { %v628_v15 = vpop.xlane.xlu2 %627 }
 0x216   :  { %v930_v55 = vpop.xlane.xlu1 %929 }
 0x217   :  { %v927_v26 = vpop.xlane.xlu0 %926  ;;  %v934_v56 = vperm.slane %v930_v55, %v1282_v35 }
 0x218   :  { %v933_v53 = vperm.slane %v927_v26, %v1282_v35 }
 0x21a   :  { %v935_v14 = vsel %vm154_vm7, %v934_v56, %v933_v53 }
 0x21b   :  { %v937_v57 = vsel %vm919_vm6, %v935_v14, 0.0 }
 0x21c   :  { %938 = vadd.xlane.f32.xlu1 %v937_v57 }
 0x21e   :  { %v222_v0 = vpop.xlane.xlu1 %221 }
 0x21f   :  { %v611_v58 = vpop.xlane.xlu0 %610  ;;  %v223_v1 = vmul.f32 %v222_v0, %v1394_v50 }
 0x220   :  { %v629_v6 = vmul.f32 %v628_v15, %v611_v58 }
 0x221   :  { %v224_v5 = vmax.f32 %v223_v1, 1e-16 }
 0x222   :  { %v630_v9 = vmax.f32 %v629_v6, 1e-16 }
 0x223   :  { %1047 = vrsqrt.f32 %v224_v5  ;;  %vm231_vm9 = vweird.f32 %v224_v5 }
 0x224   :  { %1049 = vrsqrt.f32 %v630_v9  ;;  %vm637_vm13 = vweird.f32 %v630_v9 }
 0x226   :  { %v160_v27 = vpop.xlane.xlu1 %159 }
 0x227   :  { %v947_v59 = vpop.xlane.xlu0 %946 }
 0x228   :  { %v951_v2 = vperm.slane %v947_v59, %v1282_v35 }
 0x229   :  { %v1048_v7 = vpop.eup %1047 }
 0x22a   :  { %v944_v61 = vpop.xlane.xlu2 %943  ;;  %v226_v11 = vmul.f32 %v1048_v7, %v224_v5  ;;  %v1050_v13 = vpop.eup %1049  ;;  %vm232_vm8 = vweird.f32 %v1048_v7 }
 0x22b   :  { %v950_v60 = vperm.slane %v944_v61, %v1282_v35  ;;  %v632_v19 = vmul.f32 %v1050_v13, %v630_v9  ;;  %vm233_vm10 = vmor %vm231_vm9, %vm232_vm8  ;;  %vm638_vm12 = vweird.f32 %v1050_v13 }
 0x22c   :  { %v227_v12 = vmul.f32 %v1048_v7, %v226_v11  ;;  %vm639_vm14 = vmor %vm637_vm13, %vm638_vm12 }
 0x22d   :  { %v952_v62 = vsel %vm154_vm7, %v951_v2, %v950_v60  ;;  %v633_v51 = vmul.f32 %v1050_v13, %v632_v19 }
 0x22e   :  { %v954_v63 = vsel %vm919_vm6, %v952_v62, 0.0  ;;  %v228_v50 = vmul.f32 0.5, %v227_v12 }
 0x22f   :  { %955 = vadd.xlane.f32.xlu2 %v954_v63  ;;  %v909_v18 = vpop.xlane.xlu0 %908  ;;  %v634_v21 = vmul.f32 0.5, %v633_v51 }
 0x230   :  { %v229_v8 = vsub.f32 1.5, %v228_v50  ;;  %v915_v33 = vperm.slane %v909_v18, %v1282_v35 }
 0x231   :  { %v635_v4 = vsub.f32 1.5, %v634_v21 }
 0x232   :  { %v230_v20 = vmul.f32 %v1048_v7, %v229_v8 }
 0x233   :  { %v636_v17 = vmul.f32 %v1050_v13, %v635_v4 }
 0x234   :  { %v234_v16 = vsel %vm233_vm10, %v1048_v7, %v230_v20 }
 0x235   :  { %340 = vrot.lane.b32.xlu1 %v338_v3, %s1068_s9  ;;  %v235_v54 = vmul.f32 %v234_v16, %v160_v27  ;;  %v640_v30 = vsel %vm639_vm14, %v1050_v13, %v636_v17 }
 0x237   :  { %v912_v24 = vpop.xlane.xlu0 %911  ;;  %v237_v28 = vsel %vm236_vm11, %v235_v54, 0.0 }
 0x238   :  { %v916_v32 = vperm.slane %v912_v24, %v1282_v35 }
 0x23a   :  { %v917_v34 = vsel %vm154_vm7, %v916_v32, %v915_v33 }
 0x23b   :  { %v920_v42 = vsel %vm919_vm6, %v917_v34, 0.0 }
 0x23f   :  { %v594_v29 = vpop.xlane.xlu0 %593 }
 0x240   :  { %v641_v31 = vmul.f32 %v640_v30, %v594_v29 }
 0x242   :  { %v642_v22 = vsel %vm236_vm11, %v641_v31, 0.0 }
 0x247   :  { %285 = vrot.lane.b32.xlu2 %v283_v10, %s1068_s9 }
 0x252   :  { %v693_v44 = vpop.permute.xlu0 %692 }
 0x253   :  { %v695_v35 = vmul.f32 %v693_v44, %v1349_v43 }
 0x255   :  { %v696_v46 = vsel %vm236_vm11, %v695_v35, 0.0 }
 0x25f   :  { %238 = vadd.xlane.f32.xlu1 %v237_v28 }
 0x267   :  { %643 = vadd.xlane.f32.xlu1 %v642_v22 }
 0x270   :  { %921 = vadd.xlane.f32.xlu2 %v920_v42 }
 0x28f   :  { %v939_v23 = vpop.xlane.xlu1 %938 }
 0x2a2   :  { %v956_v36 = vpop.xlane.xlu2 %955 }
 0x2a3   :  { %v957_v48 = vmul.f32 %v956_v36, %v939_v23 }
 0x2a5   :  { %v958_v49 = vmax.f32 %v957_v48, 1e-16 }
 0x2a7   :  { %v341_v37 = vpop.permute.xlu1 %340  ;;  %1051 = vrsqrt.f32 %v958_v49  ;;  %vm965_vm15 = vweird.f32 %v958_v49 }
 0x2a8   :  { %v343_v38 = vmul.f32 %v341_v37, %v1357_v52 }
 0x2aa   :  { %v286_v39 = vpop.permute.xlu2 %285  ;;  %v344_v41 = vsel %vm236_vm11, %v343_v38, 0.0 }
 0x2ab   :  { %v288_v40 = vmul.f32 %v286_v39, %v1353_v47  ;;  %345 = vadd.xlane.f32.xlu2 %v344_v41 }
 0x2ad   :  { %v289_v45 = vsel %vm236_vm11, %v288_v40, 0.0  ;;  %v1052_v25 = vpop.eup %1051 }
 0x2ae   :  { %290 = vadd.xlane.f32.xlu0 %v289_v45  ;;  %v960_v52 = vmul.f32 %v1052_v25, %v958_v49  ;;  %vm966_vm7 = vweird.f32 %v1052_v25 }
 0x2af   :  { %vm967_vm1 = vmor %vm965_vm15, %vm966_vm7 }
 0x2b0   :  { %v961_v26 = vmul.f32 %v1052_v25, %v960_v52 }
 0x2b2   :  { %v962_v55 = vmul.f32 0.5, %v961_v26 }
 0x2b3   :  { %697 = vadd.xlane.f32.xlu2 %v696_v46 }
 0x2b4   :  { %v963_v15 = vsub.f32 1.5, %v962_v55 }
 0x2b6   :  { %v964_v61 = vmul.f32 %v1052_v25, %v963_v15 }
 0x2b8   :  { %v968_v2 = vsel %vm967_vm1, %v1052_v25, %v964_v61 }
 0x2d2   :  { %v239_v53 = vpop.xlane.xlu1 %238 }
 0x2d3   :  { %v240_v47 = vrot.slane %v239_v53, 4 }
 0x2d5   :  { %v241_v56 = vadd.f32 %v240_v47, %v239_v53 }
 0x2d7   :  { %v242_v14 = vrot.slane %v241_v56, 2 }
 0x2d9   :  { %v243_v57 = vadd.f32 %v242_v14, %v241_v56 }
 0x2da   :  { %v644_v63 = vpop.xlane.xlu1 %643 }
 0x2db   :  { %v244_v58 = vrot.slane %v243_v57, 1  ;;  %v645_v0 = vrot.slane %v644_v63, 4 }
 0x2dd   :  { %v245_v59 = vadd.f32 %v244_v58, %v243_v57  ;;  %v646_v1 = vadd.f32 %v645_v0, %v644_v63 }
 0x2df   :  { %1026 = vpush %v245_v59  ;;  %v647_v7 = vrot.slane %v646_v1, 2 }
 0x2e1   :  { %v648_v13 = vadd.f32 %v647_v7, %v646_v1 }
 0x2e3   :  { %v922_v43 = vpop.xlane.xlu2 %921  ;;  %v649_v24 = vrot.slane %v648_v13, 1 }
 0x2e4   :  { %v969_v60 = vmul.f32 %v968_v2, %v922_v43 }
 0x2e5   :  { %v650_v17 = vadd.f32 %v649_v24, %v648_v13 }
 0x2e6   :  { %v970_v62 = vsel %vm236_vm11, %v969_v60, 0.0 }
 0x2e7   :  { %971 = vadd.xlane.f32.xlu0 %v970_v62 }
 0x310   :  { %s1027_s10 = spop %1026 }
 0x311   :  { %s301_s24 = smul.f32 0.5, %s1027_s10 }
 0x31e   :  { %v346_v3 = vpop.xlane.xlu2 %345 }
 0x31f   :  { %v347_v5 = vrot.slane %v346_v3, 4 }
 0x321   :  { %v291_v6 = vpop.xlane.xlu0 %290  ;;  %v348_v10 = vadd.f32 %v347_v5, %v346_v3 }
 0x322   :  { %v292_v9 = vrot.slane %v291_v6, 4 }
 0x323   :  { %v349_v12 = vrot.slane %v348_v10, 2 }
 0x324   :  { %v293_v11 = vadd.f32 %v292_v9, %v291_v6 }
 0x325   :  { %v350_v18 = vadd.f32 %v349_v12, %v348_v10 }
 0x326   :  { %v294_v50 = vrot.slane %v293_v11, 2  ;;  %v698_v19 = vpop.xlane.xlu2 %697 }
 0x327   :  { %v699_v51 = vrot.slane %v698_v19, 4  ;;  %v351_v20 = vrot.slane %v350_v18, 1 }
 0x328   :  { %v295_v8 = vadd.f32 %v294_v50, %v293_v11 }
 0x329   :  { %v700_v16 = vadd.f32 %v699_v51, %v698_v19  ;;  %v352_v54 = vadd.f32 %v351_v20, %v350_v18 }
 0x32a   :  { %v296_v21 = vrot.slane %v295_v8, 1 }
 0x32b   :  { %v701_v4 = vrot.slane %v700_v16, 2 }
 0x32c   :  { %v297_v27 = vadd.f32 %v296_v21, %v295_v8 }
 0x32d   :  { %v702_v28 = vadd.f32 %v701_v4, %v700_v16 }
 0x32e   :  { %1028 = vpush %v297_v27 }
 0x32f   :  { %1030 = vpush %v352_v54  ;;  %v703_v29 = vrot.slane %v702_v28, 1 }
 0x330   :  { %1032 = vpush %v650_v17 }
 0x331   :  { %v704_v30 = vadd.f32 %v703_v29, %v702_v28 }
 0x333   :  { %1034 = vpush %v704_v30 }
 0x35a   :  { %v972_v31 = vpop.xlane.xlu0 %971 }
 0x35b   :  { %v973_v32 = vrot.slane %v972_v31, 4 }
 0x35d   :  { %v974_v22 = vadd.f32 %v973_v32, %v972_v31 }
 0x35f   :  { %v975_v33 = vrot.slane %v974_v22, 2  ;;  %s1029_s19 = spop %1028 }
 0x360   :  { %s1031_s20 = spop %1030  ;;  %s299_s5 = ssub.f32 0.0, %s1029_s19 }
 0x361   :  { %v976_v34 = vadd.f32 %v975_v33, %v974_v22  ;;  %s354_s21 = ssub.f32 0.0, %s1031_s20  ;;  %s1033_s4 = spop %1032 }
 0x362   :  { %s652_s22 = smul.f32 0.5, %s1033_s4 }
 0x363   :  { %v977_v42 = vrot.slane %v976_v34, 1  ;;  %s355_s7 = smul.f32 5.0, %s354_s21 }
 0x364   :  { %s1035_s23 = spop %1034  ;;  %s300_s25 = smul.f32 5.0, %s299_s5 }
 0x365   :  { %v978_v23 = vadd.f32 %v977_v42, %v976_v34  ;;  %s653_s0 = ssub.f32 %s355_s7, %s652_s22 }
 0x366   :  { %s706_s1 = ssub.f32 0.0, %s1035_s23 }
 0x367   :  { %1036 = vpush %v978_v23  ;;  %s654_s26 = smul.f32 0.5, %s653_s0  ;;  %s302_s8 = ssub.f32 %s300_s25, %s301_s24 }
 0x368   :  { %s707_s27 = smul.f32 5.0, %s706_s1 }
 0x369   :  { %s655_s2 = sadd.f32 %s654_s26, %s302_s8 }
 0x398   :  { %s1037_s28 = spop %1036 }
 0x399   :  { %s980_s29 = smul.f32 0.5, %s1037_s28 }
 0x39b   :  { %s981_s30 = ssub.f32 %s707_s27, %s980_s29 }
 0x39d   :  { %s982_s12 = smul.f32 0.25, %s981_s30 }
 0x39f   :  { %s983_s3 = sadd.f32 %s982_s12, %s655_s2 }
 0x3a1   :  { %s984_s15 = smul.f32 0.33333334, %s983_s3 }
 0x3a3   :  { %986 = sst [smem:[#allocation3]] %s984_s15 }
 0x3a4   :  { %995 = dma.smem_to_hbm %s1069_s6, 16, %s993_s14, [#allocation4]  }
 0x3a5   :  { %1065 = dma.done.wait [#allocation4], 16  }
 0x3a6   :  { %1066 = vsyncadd [#allocation4], 4294967280 }
 0x3a7   :  { %1000 = sfence }
 0x3a8   :  { %1001 = vsyncpa [#allocation4], 1 }

</bundles_post_ra>
